<compile_context>
chip_gen: v6e
topology: v6e:2x2x1
jax: 0.10.0
libtpu: 0.0.40
codegen_flags: <defaults>
</compile_context>

<pallas_src>
import math

import jax
import jax.numpy as jnp
from jax.experimental import pallas as pl
from jax.experimental.pallas import tpu as pltpu


def _round_up(n, m):
    return ((n + m - 1) // m) * m


def _cdiv(a, b):
    return (a + b - 1) // b


def attention_kernel(x_ref, wblk_ref, bias_ref, eblk_ref, pfold_ref, o_ref):
    # x_ref:     (TB, S*F)  lane-dense batch tile (x flattened over (S, F))
    # wblk_ref:  (S*F, S)   block-diagonal copies of the (F, 1) weight
    # bias_ref:  (1, S)
    # eblk_ref:  (S, S*F)   0/1 matrix: expands a[t, s] across the F lanes of segment s
    # pfold_ref: (S*F, F)   0/1 matrix: folds segments, out[t,f] = sum_s w[t, s*F+f]
    # o_ref:     (TB, F)
    x = x_ref[...]  # native dtype, loaded once

    # eij[t, s] = sum_f x[t, s, f] * w[f]   -- segmented dot on the idle MXU.
    eij = jnp.dot(
        x, wblk_ref[...],
        preferred_element_type=jnp.float32,
        precision=jax.lax.Precision.HIGHEST,
    )                                                        # (TB, S)
    eij = jnp.tanh(eij + bias_ref[...])                      # EUP

    a = jnp.exp(eij)                                         # (TB, S)
    denom = jnp.sum(a, axis=-1, keepdims=True)               # (TB, 1), tiny reduce
    a = a / denom + 1e-10                                    # exact divide (correctness)

    # Broadcast a[t, s] across the F lanes of segment s (MXU, lane-dense result).
    a_expand = jnp.dot(
        a, eblk_ref[...],
        preferred_element_type=jnp.float32,
        precision=jax.lax.Precision.HIGHEST,
    )                                                        # (TB, S*F)

    # Fully lane-dense VPU multiply.  (For bf16 inputs this is the only f32
    # materialization of the tile and it feeds the fold matmul directly.)
    weighted = x.astype(jnp.float32) * a_expand              # (TB, S*F)

    # out[t, f] = sum_s weighted[t, s*F + f]  -- segmented lane fold on the MXU.
    out = jnp.dot(
        weighted, pfold_ref[...],
        preferred_element_type=jnp.float32,
        precision=jax.lax.Precision.HIGHEST,
    )                                                        # (TB, F)
    o_ref[...] = out.astype(o_ref.dtype)


def attention_forward(x, weight, bias, *, block_b=None, vmem_limit_bytes=None):
    """Additive attention pooling.  x: (B, S, F), weight: (F, 1), bias: (S,).

    Returns (B, F)."""
    B, S, F = x.shape
    SF = S * F
    in_itemsize = jnp.dtype(x.dtype).itemsize
    sf_pad = _round_up(SF, 128)
    f_pad = _round_up(F, 128)

    # ---- per-generation VMEM budget ----------------------------------------
    if vmem_limit_bytes is None:
        try:
            vmem_cap = int(pltpu.get_tpu_info().vmem_capacity_bytes)
        except Exception:
            vmem_cap = 64 * 1024 * 1024  # conservative fallback (safe on v7x)
        # ~half of physical VMEM: 64 MiB on v5e/v6e (128 MiB), 32 MiB on v7x (64 MiB).
        vmem_limit_bytes = min(vmem_cap // 2, 64 * 1024 * 1024)
    vmem_limit_bytes = int(vmem_limit_bytes)

    # ---- tile sizing (lane-padded, post-upcast accounting) -----------------
    if block_b is None:
        # Per batch row: double-buffered native-dtype input tile
        #              + ~2 lane-padded f32 intermediates (a_expand / weighted)
        #              + double-buffered output block.
        bytes_per_row = sf_pad * (2 * in_itemsize + 2 * 4) + 2 * 4 * f_pad
        budget = (vmem_limit_bytes * 2) // 3  # headroom for resident constants etc.
        rows = max(8, budget // max(bytes_per_row, 1))
        rows = (rows // 8) * 8
        # Keep the grid at ~>=8 steps so DMA/compute overlap and (on v7x) both
        # TensorCores get work; never let a single tile swallow the batch.
        cap_rows = max(8, _round_up(_cdiv(B, 8), 8))
        block_b = max(8, min(rows, cap_rows))
    tb = int(block_b)
    # TODO(synk): if even the minimum 8-row tile exceeds the VMEM budget
    # (very large S*F), an extra F-tiling grid axis (accumulator + pl.when
    # init/finalize) or a split eij/pooling kernel would be required.

    b_pad = _round_up(B, tb)

    # Lane-dense layout: flatten (S, F) into one last axis of S*F (a free
    # row-major reshape), so VMEM tiles carry full 128-lane vregs.
    x_flat = x.reshape(B, SF)
    if b_pad != B:
        # Zero padding is numerically safe (tanh-bounded exp, positive denom).
        x_flat = jnp.pad(x_flat, ((0, b_pad - B), (0, 0)))

    w = weight.reshape(F, 1).astype(jnp.float32)
    eye_s = jnp.eye(S, dtype=jnp.float32)
    wblk = jnp.kron(eye_s, w)                                        # (S*F, S)
    eblk = jnp.kron(eye_s, jnp.ones((1, F), jnp.float32))            # (S, S*F)
    pfold = jnp.kron(jnp.ones((S, 1), jnp.float32),
                     jnp.eye(F, dtype=jnp.float32))                  # (S*F, F)
    b2d = bias.reshape(1, S).astype(jnp.float32)

    out = pl.pallas_call(
        attention_kernel,
        out_shape=jax.ShapeDtypeStruct((b_pad, F), x.dtype),
        grid_spec=pltpu.PrefetchScalarGridSpec(
            num_scalar_prefetch=0,
            grid=(b_pad // tb,),
            in_specs=[
                pl.BlockSpec((tb, SF), lambda i: (i, 0)),    # x tile (streamed)
                pl.BlockSpec((SF, S), lambda i: (0, 0)),     # Wblk   (resident)
                pl.BlockSpec((1, S), lambda i: (0, 0)),      # bias   (resident)
                pl.BlockSpec((S, SF), lambda i: (0, 0)),     # Eblk   (resident)
                pl.BlockSpec((SF, F), lambda i: (0, 0)),     # Pfold  (resident)
            ],
            out_specs=pl.BlockSpec((tb, F), lambda i: (i, 0)),
        ),
        compiler_params=pltpu.CompilerParams(
            dimension_semantics=("parallel",),
            vmem_limit_bytes=vmem_limit_bytes,
        ),
    )(x_flat, wblk, b2d, eblk, pfold)
    # TODO(synk): the (TB, F<128) output block still uses masked lane stores;
    # output traffic is only ~1/S of the input stream so a lane-dense output
    # repack was not added.
    return out[:B]


def attention_reference(x, weight, bias):
    """Pure-JAX reference matching the PyTorch forward exactly."""
    B, S, F = x.shape
    eij = (x.reshape(-1, F) @ weight).reshape(B, S)
    eij = jnp.tanh(eij + bias)
    a = jnp.exp(eij)
    a = a / jnp.sum(a, axis=1, keepdims=True) + 1e-10
    return jnp.sum(x * a[..., None], axis=1)


if __name__ == "__main__":
    batch, step_dim, feature_dim = 2, 8, 32

    key = jax.random.PRNGKey(0)
    kx, kw, kb = jax.random.split(key, 3)

    # Deterministic parameter init (shapes from module __init__):
    #   weight: (feature_dim, 1), xavier_uniform; b: (step_dim,)
    bound = math.sqrt(6.0 / (feature_dim + 1))
    weight = jax.random.uniform(
        kw, (feature_dim, 1), jnp.float32, -bound, bound
    )
    bias = 0.1 * jax.random.normal(kb, (step_dim,), dtype=jnp.float32)

    x = jax.random.normal(kx, (batch, step_dim, feature_dim), dtype=jnp.float32)

    out = attention_forward(x, weight, bias)
    out = jax.block_until_ready(out)

    ref = attention_reference(x, weight, bias)
    assert out.shape == (batch, feature_dim)
    # Exact divide + high-precision MXU matmuls -> tight agreement.
    assert jnp.allclose(out, ref, atol=1e-5, rtol=1e-5), (out, ref)

    print("KERNEL_OK")
</pallas_src>

<mosaic_0001>
module attributes {stable_mosaic.version = 11 : i64} {
  func.func @attention_kernel(%arg0: i32, %arg1: memref<8x256xf32, #tpu.memory_space<vmem>>, %arg2: memref<256x8xf32, #tpu.memory_space<vmem>>, %arg3: memref<1x8xf32, #tpu.memory_space<vmem>>, %arg4: memref<8x256xf32, #tpu.memory_space<vmem>>, %arg5: memref<256x32xf32, #tpu.memory_space<vmem>>, %arg6: memref<8x32xf32, #tpu.memory_space<vmem>>) attributes {dimension_semantics = [#tpu.dimension_semantics<parallel>], iteration_bounds = array<i64: 1>, scalar_prefetch = 0 : i64, scratch_operands = 0 : i64, tpu.core_type = #tpu.core_type<tc>, window_params = [{transform_indices = @transform_0, window_bounds = array<i64: 8, 256>}, {pipeline_mode = #tpu.pipeline_mode<synchronous>, transform_indices = @transform_1, window_bounds = array<i64: 256, 8>}, {pipeline_mode = #tpu.pipeline_mode<synchronous>, transform_indices = @transform_2, window_bounds = array<i64: 1, 8>}, {pipeline_mode = #tpu.pipeline_mode<synchronous>, transform_indices = @transform_3, window_bounds = array<i64: 8, 256>}, {pipeline_mode = #tpu.pipeline_mode<synchronous>, transform_indices = @transform_4, window_bounds = array<i64: 256, 32>}, {transform_indices = @transform_5, window_bounds = array<i64: 8, 32>}]} {
    %c0 = arith.constant 0 : index
    %c0_0 = arith.constant 0 : index
    %0 = vector.load %arg1[%c0, %c0_0] : memref<8x256xf32, #tpu.memory_space<vmem>>, vector<8x256xf32>
    %c0_1 = arith.constant 0 : index
    %c0_2 = arith.constant 0 : index
    %1 = vector.load %arg2[%c0_1, %c0_2] : memref<256x8xf32, #tpu.memory_space<vmem>>, vector<256x8xf32>
    %cst = arith.constant dense<0.000000e+00> : vector<8x8xf32>
    %2 = tpu.matmul %0, %1, %cst {dimension_numbers = #tpu.dot_dimension_numbers<[1], [0], [0], [1], [0, 0, 1, 1], [], []>, precision = #tpu.contract_precision<fp32>} : vector<8x256xf32>, vector<256x8xf32>, vector<8x8xf32> -> vector<8x8xf32>
    %c0_3 = arith.constant 0 : index
    %c0_4 = arith.constant 0 : index
    %3 = vector.load %arg3[%c0_3, %c0_4] : memref<1x8xf32, #tpu.memory_space<vmem>>, vector<1x8xf32>
    %4 = vector.broadcast %3 : vector<1x8xf32> to vector<8x8xf32>
    %5 = arith.addf %2, %4 : vector<8x8xf32>
    %6 = math.tanh %5 : vector<8x8xf32>
    %7 = math.exp %6 : vector<8x8xf32>
    %cst_5 = arith.constant dense<0.000000e+00> : vector<8xf32>
    %8 = vector.multi_reduction <add>, %7, %cst_5 [1] : vector<8x8xf32> to vector<8xf32>
    %9 = vector.shape_cast %8 : vector<8xf32> to vector<8x1xf32>
    %10 = vector.broadcast %9 : vector<8x1xf32> to vector<8x8xf32>
    %11 = arith.divf %7, %10 : vector<8x8xf32>
    %cst_6 = arith.constant 1.000000e-10 : f32
    %12 = vector.broadcast %cst_6 : f32 to vector<8x8xf32>
    %13 = arith.addf %11, %12 : vector<8x8xf32>
    %c0_7 = arith.constant 0 : index
    %c0_8 = arith.constant 0 : index
    %14 = vector.load %arg4[%c0_7, %c0_8] : memref<8x256xf32, #tpu.memory_space<vmem>>, vector<8x256xf32>
    %cst_9 = arith.constant dense<0.000000e+00> : vector<8x256xf32>
    %15 = tpu.matmul %13, %14, %cst_9 {dimension_numbers = #tpu.dot_dimension_numbers<[1], [0], [0], [1], [0, 0, 1, 1], [], []>, precision = #tpu.contract_precision<fp32>} : vector<8x8xf32>, vector<8x256xf32>, vector<8x256xf32> -> vector<8x256xf32>
    %16 = arith.mulf %0, %15 : vector<8x256xf32>
    %c0_10 = arith.constant 0 : index
    %c0_11 = arith.constant 0 : index
    %17 = vector.load %arg5[%c0_10, %c0_11] : memref<256x32xf32, #tpu.memory_space<vmem>>, vector<256x32xf32>
    %cst_12 = arith.constant dense<0.000000e+00> : vector<8x32xf32>
    %18 = tpu.matmul %16, %17, %cst_12 {dimension_numbers = #tpu.dot_dimension_numbers<[1], [0], [0], [1], [0, 0, 1, 1], [], []>, precision = #tpu.contract_precision<fp32>} : vector<8x256xf32>, vector<256x32xf32>, vector<8x32xf32> -> vector<8x32xf32>
    %c0_13 = arith.constant 0 : index
    %c0_14 = arith.constant 0 : index
    %19 = vector.load %arg6[%c0_13, %c0_14] : memref<8x32xf32, #tpu.memory_space<vmem>>, vector<8x32xf32>
    tpu.vector_store %arg6[%c0_13, %c0_14], %18 {strides = array<i32>} : memref<8x32xf32, #tpu.memory_space<vmem>>, vector<8x32xf32>,
    return
  }
  func.func @transform_0(%arg0: i32) -> (i32, i32) {
    %c0_i32 = arith.constant 0 : i32
    %c0_i32_0 = arith.constant 0 : i32
    return %arg0, %c0_i32 : i32, i32
  }
  func.func @transform_1(%arg0: i32) -> (i32, i32) {
    %c0_i32 = arith.constant 0 : i32
    %c0_i32_0 = arith.constant 0 : i32
    %c0_i32_1 = arith.constant 0 : i32
    return %c0_i32, %c0_i32_0 : i32, i32
  }
  func.func @transform_2(%arg0: i32) -> (i32, i32) {
    %c0_i32 = arith.constant 0 : i32
    %c0_i32_0 = arith.constant 0 : i32
    %c0_i32_1 = arith.constant 0 : i32
    return %c0_i32, %c0_i32_0 : i32, i32
  }
  func.func @transform_3(%arg0: i32) -> (i32, i32) {
    %c0_i32 = arith.constant 0 : i32
    %c0_i32_0 = arith.constant 0 : i32
    %c0_i32_1 = arith.constant 0 : i32
    return %c0_i32, %c0_i32_0 : i32, i32
  }
  func.func @transform_4(%arg0: i32) -> (i32, i32) {
    %c0_i32 = arith.constant 0 : i32
    %c0_i32_0 = arith.constant 0 : i32
    %c0_i32_1 = arith.constant 0 : i32
    return %c0_i32, %c0_i32_0 : i32, i32
  }
  func.func @transform_5(%arg0: i32) -> (i32, i32) {
    %c0_i32 = arith.constant 0 : i32
    %c0_i32_0 = arith.constant 0 : i32
    return %arg0, %c0_i32 : i32, i32
  }
}

</mosaic_0001>

<bundles_post_ra>
// kernel: tpu_custom_call.1
= control target key start
LH: loop header
LB: loop body
LE: loop exit
PB: predicated region body
PF: predicated region fallthrough
CT: control target
= control target key end

     0   :  { %s4146_s0 = inlined_call_operand.vmem [shape: f32[8,256], index: 0, kind: input, shape index: {}]   ;;  %s4147_s1 = inlined_call_operand.vmem [shape: f32[256,8], index: 1, kind: input, shape index: {}]   ;;  %s4148_s2 = inlined_call_operand.vmem [shape: f32[1,8], index: 2, kind: input, shape index: {}]   ;;  %s4149_s3 = inlined_call_operand.vmem [shape: f32[8,256], index: 3, kind: input, shape index: {}]   ;;  %s4150_s4 = inlined_call_operand.vmem [shape: f32[256,32], index: 4, kind: input, shape index: {}]   ;;  %s4151_s5 = inlined_call_operand.hbm [shape: f32[8,32], index: 5, kind: output, shape index: {}]  }
   0x1   :  { %v54_v0 = vld [vmem:[%s4147_s1 + $0xf8] sm:$0xff]  ;;  %v53_v2 = vld [vmem:[%s4147_s1 + $0xf0] sm:$0xff]  ;;  %v52_v7 = vld [vmem:[%s4147_s1 + $0xe8] sm:$0xff] }
   0x2   :  { %v38_v1 = vld [vmem:[%s4147_s1 + $0x78] sm:$0xff]  ;;  %v2810_v3 = vand.u32 4294901760, %v54_v0  ;;  %v2814_v5 = vand.u32 4294901760, %v53_v2  ;;  %v37_v6 = vld [vmem:[%s4147_s1 + $0x70] sm:$0xff]  ;;  %v36_v8 = vld [vmem:[%s4147_s1 + $0x68] sm:$0xff]  ;;  %v2827_v10 = vand.u32 4294901760, %v52_v7 }
   0x3   :  { %v2812_v4 = vand.u32 4294901760, %v38_v1  ;;  %v2825_v9 = vand.u32 4294901760, %v37_v6  ;;  %v2829_v11 = vand.u32 4294901760, %v36_v8  ;;  %v51_v12 = vld [vmem:[%s4147_s1 + $0xe0] sm:$0xff]  ;;  %v2840_v14 = vld [vmem:[%s4147_s1 + $0xd8] sm:$0xff]  ;;  %v2861_v20 = vld [vmem:[%s4147_s1 + $0xd0] sm:$0xff] }
   0x4   :  { %v35_v13 = vld [vmem:[%s4147_s1 + $0x60] sm:$0xff]  ;;  %2317 = vmatprep.subr.mxu0 %v2810_v3  ;;  %v2843_v15 = vand.u32 4294901760, %v51_v12  ;;  %v2848_v17 = vand.u32 4294901760, %v2840_v14  ;;  %v2851_v18 = vsub.f32 %v54_v0, %v2810_v3  ;;  %v2856_v19 = vld [vmem:[%s4147_s1 + $0x58] sm:$0xff]  ;;  %v2866_v21 = vld [vmem:[%s4147_s1 + $0x50] sm:$0xff]  ;;  %v2876_v24 = vand.u32 4294901760, %v2861_v20 }
   0x5   :  { %v2845_v16 = vand.u32 4294901760, %v35_v13  ;;  %2318 = vmatpush3.msra.mxu0 %v2812_v4  ;;  %v2870_v22 = vand.u32 4294901760, %v2856_v19  ;;  %v2873_v23 = vsub.f32 %v38_v1, %v2812_v4  ;;  %v2879_v25 = vsub.f32 %v53_v2, %v2814_v5  ;;  %v2884_v26 = vld [vmem:[%s4147_s1 + $0xc8] sm:$0xff]  ;;  %v2894_v28 = vld [vmem:[%s4147_s1 + $0xc0] sm:$0xff]  ;;  %v2946_v46 = vld [vmem:[%s4147_s1 + $0xb8] sm:$0xff] }
   0x6   :  { %v2889_v27 = vld [vmem:[%s4147_s1 + $0x48] sm:$0xff]  ;;  %2319 = vmatprep.subr.mxu0 %v2814_v5  ;;  %v4165_v29 = vand.u32 4294901760, %v2851_v18  ;;  %v2899_v30 = vand.u32 4294901760, %v2866_v21  ;;  %v2902_v31 = vsub.f32 %v37_v6, %v2825_v9  ;;  %v2905_v32 = vand.u32 4294901760, %v2884_v26  ;;  %v2919_v37 = vld [vmem:[%s4147_s1 + $0x40] sm:$0xff]  ;;  %v2959_v51 = vld [vmem:[%s4147_s1 + $0x38] sm:$0xff] }
   0x7   :  { %2320 = vmatpush3.msra.mxu0 %v2825_v9  ;;  %v4164_v33 = vand.u32 4294901760, %v2873_v23  ;;  %v4162_v34 = vand.u32 4294901760, %v2879_v25  ;;  %v2911_v35 = vsub.f32 %v52_v7, %v2827_v10  ;;  %v2914_v36 = vand.u32 4294901760, %v2889_v27  ;;  %v2969_v56 = vld [vmem:[%s4147_s1 + $0xb0] sm:$0xff] }
   0x8   :  { %4293 = vst [vmem:[#allocation5_spill] sm:$0xff] %v2899_v30  ;;  %4294 = vst [vmem:[#allocation6_spill] sm:$0xff] %v2905_v32  ;;  %2321 = vmatprep.subr.mxu0 %v2827_v10  ;;  %v290_v38 = vsub.f32 %v2851_v18, %v4165_v29  ;;  %v4161_v39 = vand.u32 4294901760, %v2902_v31  ;;  %v2927_v40 = vsub.f32 %v36_v8, %v2829_v11  ;;  %v2930_v41 = vand.u32 4294901760, %v2894_v28  ;;  %v2984_v61 = vld [vmem:[%s4147_s1 + $0x30] sm:$0xff] }
   0x9   :  { %4295 = vst [vmem:[#allocation7_spill] sm:$0xff] %v2914_v36  ;;  %2322 = vmatpush3.msra.mxu0 %v2829_v11  ;;  %v178_v42 = vsub.f32 %v2873_v23, %v4164_v33  ;;  %v297_v43 = vsub.f32 %v2879_v25, %v4162_v34  ;;  %v4159_v44 = vand.u32 4294901760, %v2911_v35  ;;  %v2941_v45 = vsub.f32 %v51_v12, %v2843_v15 }
   0xa   :  { %4296 = vst [vmem:[#allocation8_spill] sm:$0xff] %v2930_v41  ;;  %2323 = vmatprep.subr.mxu0 %v2843_v15  ;;  %v291_v47 = vand.u32 4294901760, %v290_v38  ;;  %v185_v48 = vsub.f32 %v2902_v31, %v4161_v39  ;;  %v4157_v49 = vand.u32 4294901760, %v2927_v40  ;;  %v2954_v50 = vand.u32 4294901760, %v2919_v37 }
   0xb   :  { %2324 = vmatpush3.msra.mxu0 %v2845_v16  ;;  %v179_v52 = vand.u32 4294901760, %v178_v42  ;;  %v298_v53 = vand.u32 4294901760, %v297_v43  ;;  %v304_v54 = vsub.f32 %v2911_v35, %v4159_v44  ;;  %v4156_v55 = vand.u32 4294901760, %v2941_v45 }
   0xc   :  { %4297 = vst [vmem:[#allocation9_spill] sm:$0xff] %v2954_v50  ;;  %2325 = vmatprep.subr.mxu0 %v2848_v17  ;;  %2352 = vmatprep.subr.mxu1 %v291_v47  ;;  %v186_v57 = vand.u32 4294901760, %v185_v48  ;;  %v192_v58 = vsub.f32 %v2927_v40, %v4157_v49  ;;  %v2976_v59 = vsub.f32 %v35_v13, %v2845_v16  ;;  %v2979_v60 = vand.u32 4294901760, %v2946_v46 }
   0xe   :  { %4298 = vst [vmem:[#allocation10_spill] sm:$0xff] %v2979_v60 }
   0xf   :  { %10 = vsyncpa [#allocation3], 0  ;;  %2326 = vmatpush3.msra.mxu0 %v2870_v22  ;;  %2353 = vmatpush3.msra.mxu1 %v179_v52  ;;  %v305_v62 = vand.u32 4294901760, %v304_v54  ;;  %v311_v63 = vsub.f32 %v2941_v45, %v4156_v55  ;;  %v2992_v0 = vsub.f32 %v2840_v14, %v2848_v17  ;;  %v2995_v1 = vand.u32 4294901760, %v2959_v51  ;;  %v3000_v2 = vld [vmem:[%s4147_s1 + $0xa8] sm:$0xff]  ;;  %v3093_v49 = vld [vmem:[%s4147_s1 + $0x18] sm:$0xff] }
  0x10   :  { %2327 = vmatprep.subr.mxu0 %v2876_v24  ;;  %2354 = vmatprep.subr.mxu1 %v298_v53  ;;  %v193_v6 = vand.u32 4294901760, %v192_v58  ;;  %v4154_v7 = vand.u32 4294901760, %v2976_v59  ;;  %v3006_v8 = vsub.f32 %v2856_v19, %v2870_v22  ;;  %v3009_v12 = vand.u32 4294901760, %v2969_v56  ;;  %v3014_v13 = vld [vmem:[%s4147_s1 + $0x28] sm:$0xff]  ;;  %v3109_v44 = vld [vmem:[%s4147_s1 + $0x90] sm:$0xff] }
  0x11   :  { %4299 = vst [vmem:[#allocation11_spill] sm:$0xff] %v2995_v1  ;;  %2328 = vmatpush3.msra.mxu0 %v2899_v30  ;;  %2355 = vmatpush3.msra.mxu1 %v186_v57  ;;  %v312_v14 = vand.u32 4294901760, %v311_v63  ;;  %v4152_v38 = vand.u32 4294901760, %v2992_v0  ;;  %v3020_v42 = vsub.f32 %v2861_v20, %v2876_v24  ;;  %v3023_v19 = vand.u32 4294901760, %v2984_v61  ;;  %v3040_v20 = vld [vmem:[%s4147_s1 + $0xa0] sm:$0xff]  ;;  %v3136_v33 = vld [vmem:[%s4147_s1 + $0x88] sm:$0xff] }
  0x12   :  { %4300 = vst [vmem:[#allocation12_spill] sm:$0xff] %v3009_v12  ;;  %2329 = vmatprep.subr.mxu0 %v2905_v32  ;;  %2356 = vmatprep.subr.mxu1 %v305_v62  ;;  %v199_v43 = vsub.f32 %v2976_v59, %v4154_v7  ;;  %v4153_v47 = vand.u32 4294901760, %v3006_v8  ;;  %v3032_v48 = vsub.f32 %v2866_v21, %v2899_v30  ;;  %v3035_v52 = vand.u32 4294901760, %v3000_v2 }
  0x13   :  { %4301 = vst [vmem:[#allocation13_spill] sm:$0xff] %v3023_v19  ;;  %2330 = vmatpush3.msra.mxu0 %v2914_v36  ;;  %2357 = vmatpush3.msra.mxu1 %v193_v6  ;;  %v318_v53 = vsub.f32 %v2992_v0, %v4152_v38  ;;  %v4155_v54 = vand.u32 4294901760, %v3020_v42  ;;  %v3049_v21 = vsub.f32 %v2884_v26, %v2905_v32  ;;  %v3052_v57 = vand.u32 4294901760, %v3014_v13  ;;  %v3066_v26 = vld [vmem:[%s4147_s1 + $0x20] sm:$0xff] }
  0x14   :  { %4302 = vst [vmem:[#allocation14_spill] sm:$0xff] %v3035_v52  ;;  %2331 = vmatprep.subr.mxu0 %v2930_v41  ;;  %2358 = vmatprep.subr.mxu1 %v312_v14  ;;  %v200_v58 = vand.u32 4294901760, %v199_v43  ;;  %v206_v62 = vsub.f32 %v3006_v8, %v4153_v47  ;;  %v4158_v63 = vand.u32 4294901760, %v3032_v48  ;;  %v3061_v6 = vsub.f32 %v2889_v27, %v2914_v36  ;;  %v3079_v27 = vld [vmem:[%s4147_s1 + $0x98] sm:$0xff] }
  0x15   :  { %4303 = vst [vmem:[#allocation15_spill] sm:$0xff] %v3052_v57  ;;  %2332 = vmatpush3.msra.mxu0 %v2954_v50  ;;  %v319_v38 = vand.u32 4294901760, %v318_v53  ;;  %v325_v14 = vsub.f32 %v3020_v42, %v4155_v54  ;;  %v4160_v43 = vand.u32 4294901760, %v3049_v21  ;;  %v3074_v47 = vand.u32 4294901760, %v3040_v20 }
  0x16   :  { %2359 = vmatpush3.msra.mxu1 %v200_v58  ;;  %2333 = vmatprep.subr.mxu0 %v2979_v60  ;;  %v207_v7 = vand.u32 4294901760, %v206_v62  ;;  %v213_v53 = vsub.f32 %v3032_v48, %v4158_v63  ;;  %v4163_v54 = vand.u32 4294901760, %v3061_v6  ;;  %v3088_v55 = vsub.f32 %v2894_v28, %v2930_v41  ;;  %v21_v41 = vld [vmem:[%s4146_s0] sm:$0xff] }
  0x17   :  { %4304 = vst [vmem:[#allocation16_spill] sm:$0xff] %v3074_v47  ;;  %2360 = vmatprep.subr.mxu1 %v319_v38  ;;  %2334 = vmatpush3.msra.mxu0 %v2995_v1  ;;  %v326_v58 = vand.u32 4294901760, %v325_v14  ;;  %v332_v62 = vsub.f32 %v3049_v21, %v4160_v43  ;;  %v3100_v63 = vand.u32 4294901760, %v3066_v26  ;;  %v3104_v28 = vsub.f32 %v2919_v37, %v2954_v50  ;;  %v3122_v37 = vld [vmem:[%s4147_s1 + $0x10] sm:$0xff] }
  0x18   :  { %2361 = vmatpush3.msra.mxu1 %v207_v7  ;;  %2335 = vmatprep.subr.mxu0 %v3009_v12  ;;  %v214_v38 = vand.u32 4294901760, %v213_v53  ;;  %v220_v14 = vsub.f32 %v3061_v6, %v4163_v54  ;;  %v4168_v43 = vand.u32 4294901760, %v3088_v55  ;;  %v3117_v39 = vand.u32 4294901760, %v3079_v27 }
  0x19   :  { %4305 = vst [vmem:[#allocation17_spill] sm:$0xff] %v3100_v63  ;;  %2362 = vmatprep.subr.mxu1 %v326_v58  ;;  %2336 = vmatpush3.msra.mxu0 %v3023_v19  ;;  %v333_v7 = vand.u32 4294901760, %v332_v62  ;;  %v4169_v53 = vand.u32 4294901760, %v3104_v28  ;;  %v3128_v34 = vsub.f32 %v2946_v46, %v2979_v60  ;;  %v3131_v54 = vand.u32 4294901760, %v3093_v49 }
  0x1a   :  { %2363 = vmatpush3.msra.mxu1 %v214_v38  ;;  %2337 = vmatprep.subr.mxu0 %v3035_v52  ;;  %v221_v58 = vand.u32 4294901760, %v220_v14  ;;  %v339_v62 = vsub.f32 %v3088_v55, %v4168_v43  ;;  %v3144_v46 = vsub.f32 %v2959_v51, %v2995_v1  ;;  %v3147_v29 = vand.u32 4294901760, %v3109_v44  ;;  %v3164_v51 = vld [vmem:[%s4147_s1 + $0x8] sm:$0xff] }
  0x1b   :  { %4306 = vst [vmem:[#allocation18_spill] sm:$0xff] %v3131_v54  ;;  %2364 = vmatprep.subr.mxu1 %v333_v7  ;;  %2338 = vmatpush3.msra.mxu0 %v3052_v57  ;;  %v227_v38 = vsub.f32 %v3104_v28, %v4169_v53  ;;  %v3156_v60 = vsub.f32 %v2969_v56, %v3009_v12  ;;  %v3159_v43 = vand.u32 4294901760, %v3122_v37  ;;  %v3173_v56 = vand.u32 4294901760, %v3136_v33  ;;  %v3178_v12 = vld [vmem:[%s4147_s1 + $0x80] sm:$0xff] }
  0x1c   :  { %4307 = vst [vmem:[#allocation19_spill] sm:$0xff] %v3147_v29  ;;  %2365 = vmatpush3.msra.mxu1 %v221_v58  ;;  %2339 = vmatprep.subr.mxu0 %v3074_v47  ;;  %v340_v7 = vand.u32 4294901760, %v339_v62  ;;  %v3170_v14 = vsub.f32 %v2984_v61, %v3023_v19  ;;  %v4311_v1 = vand.u32 4294901760, %v3128_v34  ;;  %v3187_v61 = vsub.f32 %v3000_v2, %v3035_v52  ;;  %v3204_v2 = vld [vmem:[%s4147_s1] sm:$0xff] }
  0x1d   :  { %4308 = vst [vmem:[#allocation20_spill] sm:$0xff] %v3159_v43  ;;  %4310 = vst [vmem:[#allocation22_spill] sm:$0xff] %v3173_v56  ;;  %2340 = vmatpush3.msra.mxu0 %v3100_v63  ;;  %v228_v58 = vand.u32 4294901760, %v227_v38  ;;  %v4186_v53 = vand.u32 4294901760, %v3156_v60  ;;  %v4313_v19 = vand.u32 4294901760, %v3144_v46  ;;  %v3195_v38 = vand.u32 4294901760, %v3164_v51 }
  0x1e   :  { %4309 = vst [vmem:[#allocation21_spill] sm:$0xff] %v3170_v14  ;;  %v346_v62 = vsub.f32 %v3128_v34, %v4311_v1  ;;  %4312 = vst [vmem:[#allocation23_spill] sm:$0xff] %v3187_v61  ;;  %2366 = vmatprep.subr.mxu1 %v340_v7  ;;  %2341 = vmatprep.subr.mxu0 %v3117_v39  ;;  %v3199_v1 = vsub.f32 %v3014_v13, %v3052_v57  ;;  %v3212_v52 = vand.u32 4294901760, %v3178_v12  ;;  %v22_v13 = vld [vmem:[%s4146_s0 + $0x8] sm:$0xff]  ;;  %vm927_vm0 = vcmask 64512  }
  0x1f   :  { %v234_v50 = vsub.f32 %v3144_v46, %v4313_v19  ;;  %2367 = vmatpush3.msra.mxu1 %v228_v58  ;;  %2342 = vmatpush3.msra.mxu0 %v3131_v54  ;;  %v353_v19 = vsub.f32 %v3156_v60, %v4186_v53  ;;  %v4314_v58 = vand.u32 4294901760, %v3170_v14  ;;  %v3224_v53 = vsub.f32 %v3040_v20, %v3074_v47 }
  0x20   :  { %v347_v7 = vand.u32 4294901760, %v346_v62  ;;  %2343 = vmatprep.subr.mxu0 %v3147_v29  ;;  %v3238_v36 = vsub.f32 %v3066_v26, %v3100_v63  ;;  %v3253_v26 = vand.u32 4294901760, %v21_v41  ;;  %vm2300_vm1 = vcmask 261120  }
  0x21   :  { %v235_v57 = vand.u32 4294901760, %v234_v50  ;;  %v241_v62 = vsub.f32 %v3170_v14, %v4314_v58  ;;  %v354_v32 = vand.u32 4294901760, %v353_v19  ;;  %2344 = vmatpush3.msra.mxu0 %v3159_v43  ;;  %v4315_v50 = vand.u32 4294901760, %v3187_v61 }
  0x22   :  { %2368 = vmatprep.subr.mxu1 %v347_v7  ;;  %v3234_v58 = vand.u32 4294901760, %v3204_v2  ;;  %2345 = vmatprep.subr.mxu0 %v3173_v56  ;;  %v4316_v7 = vand.u32 4294901760, %v3199_v1  ;;  %v4197_v47 = vand.u32 4294901760, %v3224_v53  ;;  %v3245_v14 = vand.u32 4294901760, %v22_v13  ;;  %4318 = vst [vmem:[#allocation25_spill] sm:$0xff] %v3253_v26 }
  0x23   :  { %v360_v30 = vsub.f32 %v3187_v61, %v4315_v50  ;;  %2369 = vmatpush3.msra.mxu1 %v235_v57  ;;  %v242_v20 = vand.u32 4294901760, %v241_v62  ;;  %2346 = vmatpush3.msra.mxu0 %v3195_v38  ;;  %v4198_v61 = vand.u32 4294901760, %v3238_v36  ;;  %v3251_v57 = vsub.f32 %v3079_v27, %v3117_v39 }
  0x24   :  { %v248_v19 = vsub.f32 %v3199_v1, %v4316_v7  ;;  %4317 = vst [vmem:[#allocation24_spill] sm:$0xff] %v3245_v14  ;;  %2370 = vmatprep.subr.mxu1 %v354_v32  ;;  %2347 = vmatprep.subr.mxu0 %v3212_v52  ;;  %v367_v7 = vsub.f32 %v3224_v53, %v4197_v47 }
  0x25   :  { %v361_v50 = vand.u32 4294901760, %v360_v30  ;;  %2371 = vmatpush3.msra.mxu1 %v242_v20  ;;  %v3260_v30 = vsub.f32 %v22_v13, %v3245_v14  ;;  %v3264_v32 = vsub.f32 %v3093_v49, %v3131_v54  ;;  %2348 = vmatpush3.msra.mxu0 %v3234_v58  ;;  %v255_v27 = vsub.f32 %v3238_v36, %v4198_v61 }
  0x26   :  { %v249_v62 = vand.u32 4294901760, %v248_v19  ;;  %v3272_v19 = vsub.f32 %v21_v41, %v3253_v26  ;;  %v3276_v13 = vsub.f32 %v3109_v44, %v3147_v29  ;;  %v368_v47 = vand.u32 4294901760, %v367_v7  ;;  %2387 = vmatprep.subr.mxu0 %v2851_v18  ;;  %399 = vmatprep.mubr.f32.mxu1 %v3245_v14 }
  0x27   :  { %2372 = vmatprep.subr.mxu1 %v361_v50  ;;  %v4203_v49 = vand.u32 4294901760, %v3260_v30  ;;  %v4206_v50 = vand.u32 4294901760, %v3264_v32  ;;  %v3283_v61 = vsub.f32 %v3122_v37, %v3159_v43  ;;  %v256_v20 = vand.u32 4294901760, %v255_v27 }
  0x28   :  { %2373 = vmatpush3.msra.mxu1 %v249_v62  ;;  %v4319_v41 = vand.u32 4294901760, %v3251_v57  ;;  %v4320_v62 = vand.u32 4294901760, %v3272_v19  ;;  %v4321_v14 = vand.u32 4294901760, %v3276_v13  ;;  %v3310_v43 = vsub.f32 %v3164_v51, %v3195_v38 }
  0x29   :  { %2374 = vmatprep.subr.mxu1 %v368_v47  ;;  %v161_v7 = vsub.f32 %v3260_v30, %v4203_v49  ;;  %v262_v37 = vsub.f32 %v3264_v32, %v4206_v50  ;;  %v4323_v29 = vand.u32 4294901760, %v3283_v61 }
  0x2a   :  { %v374_v54 = vsub.f32 %v3251_v57, %v4319_v41  ;;  %v3300_v41 = vsub.f32 %v3136_v33, %v3173_v56  ;;  %2375 = vmatpush3.msra.mxu1 %v256_v20  ;;  %v167_v47 = vsub.f32 %v3272_v19, %v4320_v62  ;;  %v381_v49 = vsub.f32 %v3276_v13, %v4321_v14 }
  0x2b   :  { %4322 = vst [vmem:[#allocation26_spill] sm:$0xff] %v3310_v43  ;;  %v162_v50 = vand.u32 4294901760, %v161_v7  ;;  %v263_v27 = vand.u32 4294901760, %v262_v37  ;;  %v269_v33 = vsub.f32 %v3283_v61, %v4323_v29  ;;  %v4213_v62 = vand.u32 4294901760, %v3310_v43 }
  0x2c   :  { %v375_v44 = vand.u32 4294901760, %v374_v54  ;;  %v4214_v54 = vand.u32 4294901760, %v3300_v41  ;;  %v168_v20 = vand.u32 4294901760, %v167_v47  ;;  %v382_v56 = vand.u32 4294901760, %v381_v49 }
  0x2d   :  { %v3319_v14 = vsub.f32 %v3178_v12, %v3212_v52  ;;  %163 = vmatprep.mubr.f32.mxu0 %v162_v50  ;;  %v270_v51 = vand.u32 4294901760, %v269_v33  ;;  %v3326_v29 = vsub.f32 %v3204_v2, %v3234_v58  ;;  %v276_v49 = vsub.f32 %v3310_v43, %v4213_v62  ;;  %v4326_v33 = vld [vmem:[#allocation21_spill] sm:$0xff]  ;;  %v4339_v62 = vld [vmem:[#allocation16_spill] sm:$0xff] }
  0x2e   :  { %2376 = vmatprep.subr.mxu1 %v375_v44  ;;  %v388_v7 = vsub.f32 %v3300_v41, %v4214_v54  ;;  %169 = vmatmul.mubr.f32.vlgmr.msra.gmra.mxu0 %v168_v20  ;;  %v4327_v20 = vld [vmem:[#allocation5_spill] sm:$0xff]  ;;  %v4340_v54 = vand.u32 4294901760, %v2851_v18  ;;  %v4348_v18 = vand.u32 4294901760, %v2911_v35 }
  0x2f   :  { %4324 = vst [vmem:[#allocation27_spill] sm:$0xff] %v3319_v14  ;;  %2377 = vmatpush3.msra.mxu1 %v263_v27  ;;  %4325 = vst [vmem:[#allocation28_spill] sm:$0xff] %v3326_v29  ;;  %v4212_v12 = vand.u32 4294901760, %v3319_v14  ;;  %2388 = vmatpush3.msra.mxu0 %v2873_v23  ;;  %v4211_v44 = vand.u32 4294901760, %v3326_v29  ;;  %v277_v37 = vand.u32 4294901760, %v276_v49  ;;  %v4330_v49 = vld [vmem:[#allocation7_spill] sm:$0xff] }
  0x30   :  { %2378 = vmatprep.subr.mxu1 %v382_v56  ;;  %v389_v50 = vand.u32 4294901760, %v388_v7  ;;  %2389 = vmatprep.subr.mxu0 %v2879_v25  ;;  %v4329_v7 = vld [vmem:[#allocation6_spill] sm:$0xff] }
  0x31   :  { %2379 = vmatpush3.msra.mxu1 %v270_v51  ;;  %v395_v2 = vsub.f32 %v3319_v14, %v4212_v12  ;;  %536 = vmatprep.mubr.f32.mxu0 %v3260_v30  ;;  %v283_v56 = vsub.f32 %v3326_v29, %v4211_v44  ;;  %v4328_v51 = vld [vmem:[#allocation23_spill] sm:$0xff]  ;;  %v4337_v44 = vld [vmem:[#allocation14_spill] sm:$0xff] }
  0x32   :  { %2390 = vmatpush3.msra.mxu0 %v2902_v31  ;;  %2380 = vmatprep.subr.mxu1 %v389_v50  ;;  %v4331_v50 = vld [vmem:[#allocation8_spill] sm:$0xff]  ;;  %v4338_v12 = vld [vmem:[#allocation15_spill] sm:$0xff] }
  0x33   :  { %2391 = vmatprep.subr.mxu0 %v2911_v35  ;;  %2381 = vmatpush3.msra.mxu1 %v277_v37  ;;  %v396_v27 = vand.u32 4294901760, %v395_v2  ;;  %v284_v47 = vand.u32 4294901760, %v283_v56  ;;  %v4332_v37 = vld [vmem:[#allocation9_spill] sm:$0xff]  ;;  %v4333_v2 = vld [vmem:[#allocation10_spill] sm:$0xff]  ;;  %v4334_v56 = vld [vmem:[#allocation11_spill] sm:$0xff]  ;;  %v4353_v35 = vand.u32 4294901760, %v3272_v19 }
  0x34   :  { %2392 = vmatpush3.msra.mxu0 %v2927_v40 }
  0x35   :  { %2382 = vmatprep.subr.mxu1 %v396_v27  ;;  %2393 = vmatprep.subr.mxu0 %v2941_v45  ;;  %v4335_v27 = vld [vmem:[#allocation12_spill] sm:$0xff] }
  0x36   :  { %2383 = vmatpush3.msra.mxu1 %v284_v47  ;;  %2394 = vmatpush3.msra.mxu0 %v2976_v59  ;;  %v4336_v47 = vld [vmem:[#allocation13_spill] sm:$0xff] }
  0x37   :  { %401 = vmatmul.mubr.f32.vlgmr.msra.gmra.mxu1 %v3253_v26  ;;  %2395 = vmatprep.subr.mxu0 %v2992_v0  ;;  %v4341_v26 = vld [vmem:[#allocation18_spill] sm:$0xff] }
  0x38   :  { %2422 = vmatprep.subr.mxu1 %v2810_v3  ;;  %2396 = vmatpush3.msra.mxu0 %v3006_v8 }
  0x39   :  { %2423 = vmatpush3.msra.mxu1 %v2812_v4  ;;  %2397 = vmatprep.subr.mxu0 %v3020_v42 }
  0x3a   :  { %2424 = vmatprep.subr.mxu1 %v2814_v5  ;;  %2398 = vmatpush3.msra.mxu0 %v3032_v48 }
  0x3b   :  { %2425 = vmatpush3.msra.mxu1 %v2825_v9  ;;  %2399 = vmatprep.subr.mxu0 %v3049_v21 }
  0x3c   :  { %2426 = vmatprep.subr.mxu1 %v2827_v10  ;;  %2400 = vmatpush3.msra.mxu0 %v3061_v6 }
  0x3d   :  { %2427 = vmatpush3.msra.mxu1 %v2829_v11  ;;  %2401 = vmatprep.subr.mxu0 %v3088_v55 }
  0x3e   :  { %2428 = vmatprep.subr.mxu1 %v2843_v15  ;;  %2402 = vmatpush3.msra.mxu0 %v3104_v28 }
  0x3f   :  { %2429 = vmatpush3.msra.mxu1 %v2845_v16  ;;  %2403 = vmatprep.subr.mxu0 %v3128_v34 }
  0x40   :  { %2430 = vmatprep.subr.mxu1 %v2848_v17  ;;  %2404 = vmatpush3.msra.mxu0 %v3144_v46 }
  0x41   :  { %2431 = vmatpush3.msra.mxu1 %v2870_v22  ;;  %2405 = vmatprep.subr.mxu0 %v3156_v60 }
  0x42   :  { %2432 = vmatprep.subr.mxu1 %v2876_v24  ;;  %2406 = vmatpush3.msra.mxu0 %v4326_v33 }
  0x43   :  { %2433 = vmatpush3.msra.mxu1 %v4327_v20  ;;  %2407 = vmatprep.subr.mxu0 %v4328_v51 }
  0x44   :  { %2434 = vmatprep.subr.mxu1 %v4329_v7  ;;  %2408 = vmatpush3.msra.mxu0 %v3199_v1 }
  0x45   :  { %2435 = vmatpush3.msra.mxu1 %v4330_v49  ;;  %2409 = vmatprep.subr.mxu0 %v3224_v53 }
  0x46   :  { %2436 = vmatprep.subr.mxu1 %v4331_v50  ;;  %2410 = vmatpush3.msra.mxu0 %v3238_v36 }
  0x47   :  { %2437 = vmatpush3.msra.mxu1 %v4332_v37  ;;  %2411 = vmatprep.subr.mxu0 %v3251_v57 }
  0x48   :  { %2438 = vmatprep.subr.mxu1 %v4333_v2  ;;  %2412 = vmatpush3.msra.mxu0 %v3264_v32 }
  0x49   :  { %2439 = vmatpush3.msra.mxu1 %v4334_v56  ;;  %2413 = vmatprep.subr.mxu0 %v3276_v13 }
  0x4a   :  { %2440 = vmatprep.subr.mxu1 %v4335_v27  ;;  %2414 = vmatpush3.msra.mxu0 %v3283_v61 }
  0x4b   :  { %2441 = vmatpush3.msra.mxu1 %v4336_v47  ;;  %2415 = vmatprep.subr.mxu0 %v3300_v41 }
  0x4c   :  { %2442 = vmatprep.subr.mxu1 %v4337_v44  ;;  %2416 = vmatpush3.msra.mxu0 %v3310_v43  ;;  %v4342_v43 = vand.u32 4294901760, %v2873_v23  ;;  %v4349_v23 = vand.u32 4294901760, %v2927_v40  ;;  %v4355_v40 = vand.u32 4294901760, %v3006_v8  ;;  %v4374_v8 = vand.u32 4294901760, %v3300_v41 }
  0x4d   :  { %2443 = vmatpush3.msra.mxu1 %v4338_v12  ;;  %2417 = vmatprep.subr.mxu0 %v3319_v14  ;;  %v4343_v12 = vld [vmem:[#allocation19_spill] sm:$0xff]  ;;  %v4347_v14 = vld [vmem:[#allocation22_spill] sm:$0xff] }
  0x4e   :  { %2444 = vmatprep.subr.mxu1 %v4339_v62  ;;  %2418 = vmatpush3.msra.mxu0 %v3326_v29  ;;  %v4344_v62 = vand.u32 4294901760, %v2879_v25  ;;  %v4345_v29 = vld [vmem:[#allocation20_spill] sm:$0xff]  ;;  %v4350_v25 = vand.u32 4294901760, %v2941_v45  ;;  %v4356_v45 = vand.u32 4294901760, %v3020_v42  ;;  %v4375_v42 = vld [vmem:[#allocation26_spill] sm:$0xff] }
  0x4f   :  { %2445 = vmatpush3.msra.mxu1 %v3100_v63  ;;  %539 = vmatmul.mubr.f32.vlgmr.msra.gmra.mxu0 %v3272_v19  ;;  %v4346_v63 = vand.u32 4294901760, %v2902_v31  ;;  %v4351_v31 = vand.u32 4294901760, %v3260_v30  ;;  %v4385_v30 = vld [vmem:[#allocation25_spill] sm:$0xff] }
  0x50   :  { %2446 = vmatprep.subr.mxu1 %v3117_v39  ;;  %2457 = vmatprep.subr.mxu0 %v4340_v54  ;;  %v2316_v54 = vld [vmem:[%s4148_s2] ss:$0 sm:$0xff] }
  0x51   :  { %2447 = vmatpush3.msra.mxu1 %v4341_v26  ;;  %2458 = vmatpush3.msra.mxu0 %v4342_v43  ;;  %v4354_v43 = vand.u32 4294901760, %v2992_v0  ;;  %v4358_v0 = vand.u32 4294901760, %v3049_v21  ;;  %v4377_v21 = vld [vmem:[#allocation15_spill] sm:$0xff] }
  0x52   :  { %2448 = vmatprep.subr.mxu1 %v4343_v12  ;;  %2459 = vmatprep.subr.mxu0 %v4344_v62 }
  0x53   :  { %2449 = vmatpush3.msra.mxu1 %v4345_v29  ;;  %2460 = vmatpush3.msra.mxu0 %v4346_v63  ;;  %v4352_v63 = vand.u32 4294901760, %v2976_v59  ;;  %v4357_v59 = vand.u32 4294901760, %v3032_v48  ;;  %v4376_v48 = vand.u32 4294901760, %v4375_v42 }
  0x54   :  { %2450 = vmatprep.subr.mxu1 %v4347_v14  ;;  %2461 = vmatprep.subr.mxu0 %v4348_v18 }
  0x55   :  { %2451 = vmatpush3.msra.mxu1 %v3195_v38  ;;  %2462 = vmatpush3.msra.mxu0 %v4349_v23 }
  0x56   :  { %2452 = vmatprep.subr.mxu1 %v3212_v52  ;;  %2463 = vmatprep.subr.mxu0 %v4350_v25 }
  0x57   :  { %2453 = vmatpush3.msra.mxu1 %v3234_v58  ;;  %643 = vmatprep.mubr.f32.mxu1 %v4351_v31  ;;  %v935_v31 = vld [vmem:[%s4149_s3 + $0x8] sm:$0xff] }
  0x58   :  { %2464 = vmatpush3.msra.mxu0 %v4352_v63  ;;  %647 = vmatmul.mubr.f32.vlgmr.msra.gmra.mxu1 %v4353_v35  ;;  %v934_v63 = vld [vmem:[%s4149_s3] sm:$0xff]  ;;  %v969_v35 = vand.u32 4294901760, %v935_v31 }
  0x59   :  { %2465 = vmatprep.subr.mxu0 %v4354_v43  ;;  %2492 = vmatprep.subr.mxu1 %v2810_v3  ;;  %v4359_v3 = vand.u32 4294901760, %v3061_v6  ;;  %v4378_v6 = vld [vmem:[#allocation27_spill] sm:$0xff]  ;;  %v971_v43 = vand.u32 4294901760, %v934_v63 }
  0x5a   :  { %2466 = vmatpush3.msra.mxu0 %v4355_v40  ;;  %2493 = vmatpush3.msra.mxu1 %v2812_v4  ;;  %v4360_v4 = vand.u32 4294901760, %v3088_v55  ;;  %v4371_v55 = vand.u32 4294901760, %v3264_v32  ;;  %v2769_v40 = vmov 0.0  }
  0x5b   :  { %2467 = vmatprep.subr.mxu0 %v4356_v45  ;;  %2494 = vmatprep.subr.mxu1 %v2814_v5  ;;  %v4361_v5 = vand.u32 4294901760, %v3104_v28  ;;  %v4379_v28 = vand.u32 4294901760, %v4378_v6  ;;  %v3521_v45 = vsub.f32 %v935_v31, %v969_v35 }
  0x5c   :  { %2468 = vmatpush3.msra.mxu0 %v4357_v59  ;;  %2495 = vmatpush3.msra.mxu1 %v2825_v9  ;;  %v4362_v9 = vand.u32 4294901760, %v3128_v34  ;;  %v4370_v34 = vand.u32 4294901760, %v3251_v57  ;;  %v4384_v57 = vld [vmem:[#allocation17_spill] sm:$0xff]  ;;  %v3523_v59 = vsub.f32 %v934_v63, %v971_v43 }
  0x5d   :  { %2469 = vmatprep.subr.mxu0 %v4358_v0  ;;  %2496 = vmatprep.subr.mxu1 %v2827_v10  ;;  %v4363_v10 = vand.u32 4294901760, %v3144_v46  ;;  %v4381_v46 = vld [vmem:[#allocation28_spill] sm:$0xff]  ;;  %v1049_v0 = vand.u32 4294901760, %v3521_v45 }
  0x5e   :  { %2470 = vmatpush3.msra.mxu0 %v4359_v3  ;;  %2497 = vmatpush3.msra.mxu1 %v2829_v11  ;;  %v4364_v11 = vand.u32 4294901760, %v3156_v60  ;;  %v4372_v60 = vand.u32 4294901760, %v3276_v13  ;;  %v1055_v3 = vand.u32 4294901760, %v3523_v59 }
  0x5f   :  { %2471 = vmatprep.subr.mxu0 %v4360_v4  ;;  %2498 = vmatprep.subr.mxu1 %v2843_v15  ;;  %v4365_v15 = vand.u32 4294901760, %v4326_v33  ;;  %v1050_v4 = vsub.f32 %v3521_v45, %v1049_v0 }
  0x60   :  { %2472 = vmatpush3.msra.mxu0 %v4361_v5  ;;  %2499 = vmatpush3.msra.mxu1 %v2845_v16  ;;  %v4366_v16 = vand.u32 4294901760, %v4328_v51  ;;  %v1056_v5 = vsub.f32 %v3523_v59, %v1055_v3 }
  0x61   :  { %2473 = vmatprep.subr.mxu0 %v4362_v9  ;;  %2500 = vmatprep.subr.mxu1 %v2848_v17  ;;  %v4367_v17 = vand.u32 4294901760, %v3199_v1  ;;  %v4383_v1 = vld [vmem:[#allocation24_spill] sm:$0xff]  ;;  %v1051_v9 = vand.u32 4294901760, %v1050_v4 }
  0x62   :  { %2474 = vmatpush3.msra.mxu0 %v4363_v10  ;;  %2501 = vmatpush3.msra.mxu1 %v2870_v22  ;;  %v4368_v22 = vand.u32 4294901760, %v3224_v53  ;;  %v4380_v53 = vld [vmem:[#allocation16_spill] sm:$0xff]  ;;  %v1057_v10 = vand.u32 4294901760, %v1056_v5 }
  0x63   :  { %2475 = vmatprep.subr.mxu0 %v4364_v11  ;;  %2502 = vmatprep.subr.mxu1 %v2876_v24  ;;  %v4369_v24 = vand.u32 4294901760, %v3238_v36  ;;  %v4373_v36 = vand.u32 4294901760, %v3283_v61  ;;  %v4382_v61 = vand.u32 4294901760, %v4381_v46 }
  0x64   :  { %2476 = vmatpush3.msra.mxu0 %v4365_v15  ;;  %2503 = vmatpush3.msra.mxu1 %v4327_v20  ;;  %v1437_v15 = vld [vmem:[%s4150_s4 + $0xf8] sm:$0xff] }
  0x65   :  { %2477 = vmatprep.subr.mxu0 %v4366_v16  ;;  %2504 = vmatprep.subr.mxu1 %v4329_v7  ;;  %v3535_v16 = vand.u32 4294901760, %v1437_v15 }
  0x66   :  { %2478 = vmatpush3.msra.mxu0 %v4367_v17  ;;  %2505 = vmatpush3.msra.mxu1 %v4330_v49  ;;  %v1421_v17 = vld [vmem:[%s4150_s4 + $0x78] sm:$0xff] }
  0x67   :  { %2479 = vmatprep.subr.mxu0 %v4368_v22  ;;  %2506 = vmatprep.subr.mxu1 %v4331_v50  ;;  %4386 = vst [vmem:[#allocation21_spill] sm:$0xff] %v3535_v16  ;;  %v1436_v22 = vld [vmem:[%s4150_s4 + $0xf0] sm:$0xff] }
  0x68   :  { %2480 = vmatpush3.msra.mxu0 %v4369_v24  ;;  %2507 = vmatpush3.msra.mxu1 %v4332_v37  ;;  %v1420_v24 = vld [vmem:[%s4150_s4 + $0x70] sm:$0xff] }
  0x69   :  { %2481 = vmatprep.subr.mxu0 %v4370_v34  ;;  %2508 = vmatprep.subr.mxu1 %v4333_v2  ;;  %v3547_v34 = vsub.f32 %v1437_v15, %v3535_v16  ;;  %v3556_v42 = vand.u32 4294901760, %v1420_v24 }
  0x6a   :  { %2482 = vmatpush3.msra.mxu0 %v4371_v55  ;;  %2509 = vmatpush3.msra.mxu1 %v4334_v56  ;;  %v3549_v55 = vand.u32 4294901760, %v1421_v17 }
  0x6b   :  { %2483 = vmatprep.subr.mxu0 %v4372_v60  ;;  %2510 = vmatprep.subr.mxu1 %v4335_v27  ;;  %4387 = vst [vmem:[#allocation5_spill] sm:$0xff] %v3547_v34  ;;  %v3551_v60 = vand.u32 4294901760, %v1436_v22 }
  0x6c   :  { %2484 = vmatpush3.msra.mxu0 %v4373_v36  ;;  %2511 = vmatpush3.msra.mxu1 %v4336_v47  ;;  %v1435_v36 = vld [vmem:[%s4150_s4 + $0xe8] sm:$0xff]  ;;  %v3560_v6 = vsub.f32 %v1421_v17, %v3549_v55 }
  0x6d   :  { %2485 = vmatprep.subr.mxu0 %v4374_v8  ;;  %2512 = vmatprep.subr.mxu1 %v4337_v44  ;;  %v3565_v46 = vsub.f32 %v1436_v22, %v3551_v60 }
  0x6e   :  { %2486 = vmatpush3.msra.mxu0 %v4376_v48  ;;  %2513 = vmatpush3.msra.mxu1 %v4377_v21  ;;  %v4241_v21 = vand.u32 4294901760, %v3547_v34 }
  0x6f   :  { %2487 = vmatprep.subr.mxu0 %v4379_v28  ;;  %2514 = vmatprep.subr.mxu1 %v4380_v53  ;;  %v3562_v28 = vand.u32 4294901760, %v1435_v36 }
  0x70   :  { %2488 = vmatpush3.msra.mxu0 %v4382_v61  ;;  %813 = vmatprep.mubr.f32.mxu0 %v4383_v1  ;;  %v3568_v61 = vsub.f32 %v1420_v24, %v3556_v42  ;;  %v1415_v24 = vld [vmem:[%s4150_s4 + $0x48] sm:$0xff] }
  0x71   :  { %2515 = vmatpush3.msra.mxu1 %v4384_v57  ;;  %815 = vmatmul.mubr.f32.vlgmr.msra.gmra.mxu0 %v4385_v30 }
  0x72   :  { %2516 = vmatprep.subr.mxu1 %v3117_v39  ;;  %917 = vmatprep.mubr.f32.mxu1 %v4383_v1 }
  0x73   :  { %2517 = vmatpush3.msra.mxu1 %v4341_v26  ;;  %1005 = vmatprep.mubr.f32.mxu0 %v2769_v40 }
  0x74   :  { %2518 = vmatprep.subr.mxu1 %v4343_v12  ;;  %970 = vmatprep.subr.mxu0 %v969_v35 }
  0x75   :  { %2519 = vmatpush3.msra.mxu1 %v4345_v29  ;;  %972 = vmatpush1.msra.mxu0 %v971_v43 }
  0x76   :  { %2520 = vmatprep.subr.mxu1 %v4347_v14  ;;  %1131 = vmatprep.subr.mxu0 %v3521_v45 }
  0x77   :  { %2521 = vmatpush3.msra.mxu1 %v3195_v38 }
  0x78   :  { %2522 = vmatprep.subr.mxu1 %v3212_v52 }
  0x79   :  { %2523 = vmatpush3.msra.mxu1 %v3234_v58 }
  0x7a   :  { %919 = vmatmul.mubr.f32.vlgmr.msra.gmra.mxu1 %v4385_v30  ;;  %1052 = vmatprep.subr.mxu1 %v1051_v9  ;;  %v1666_v30 = vsub.f32 %v3547_v34, %v4241_v21 }
  0x7b   :  { %1091 = vmatprep.mubr.f32.mxu1 %v2769_v40  ;;  %1058 = vmatpush1.msra.mxu1 %v1057_v10  ;;  %v1431_v10 = vld [vmem:[%s4150_s4 + $0xc8] sm:$0xff] }
  0x7c   :  { %1207 = vmatprep.subr.mxu1 %v969_v35  ;;  %v3676_v22 = vand.u32 4294901760, %v1431_v10 }
  0xee   :  { %v2349_v32 = vpop.f32.mrf.mxu0 }
  0xf0   :  { %v2350_v39 = vpop.f32.mrf.mxu0 }
  0xf1   :  { %v2351_v26 = vadd.f32 %v2350_v39, %v2349_v32  ;;  %v4239_v32 = vand.u32 4294901760, %v3560_v6  ;;  %v3576_v39 = vsub.f32 %v1435_v36, %v3562_v28 }
  0xf3   :  { %v171_v38 = vadd.f32 %v2351_v26, %v2316_v54  ;;  %v1667_v54 = vand.u32 4294901760, %v1666_v30 }
  0xf7   :  { %v2384_v19 = vpop.f32.mrf.mxu1 }
  0xf9   :  { %v2385_v41 = vpop.f32.mrf.mxu1 }
  0xfa   :  { %v2386_v12 = vadd.f32 %v2385_v41, %v2384_v19  ;;  %v4238_v19 = vand.u32 4294901760, %v3565_v46  ;;  %v4236_v41 = vand.u32 4294901760, %v3568_v61 }
  0xfc   :  { %v403_v33 = vadd.f32 %v2386_v12, %v171_v38  ;;  %v1561_v12 = vsub.f32 %v3568_v61, %v4236_v41 }
 0x10f   :  { %v2419_v13 = vpop.f32.mrf.mxu0 }
 0x111   :  { %v2420_v62 = vpop.f32.mrf.mxu0 }
 0x112   :  { %v2421_v44 = vadd.f32 %v2420_v62, %v2419_v13  ;;  %v1554_v62 = vsub.f32 %v3560_v6, %v4239_v32 }
 0x114   :  { %v541_v51 = vadd.f32 %v2421_v44, %v403_v33  ;;  %v1555_v44 = vand.u32 4294901760, %v1554_v62 }
 0x118   :  { %v2454_v14 = vpop.f32.mrf.mxu1 }
 0x11a   :  { %v2455_v52 = vpop.f32.mrf.mxu1 }
 0x11b   :  { %v2456_v20 = vadd.f32 %v2455_v52, %v2454_v14  ;;  %v4234_v14 = vand.u32 4294901760, %v3576_v39 }
 0x11d   :  { %v649_v50 = vadd.f32 %v2456_v20, %v541_v51  ;;  %v1562_v20 = vand.u32 4294901760, %v1561_v12  ;;  %v3708_v12 = vand.u32 4294901760, %v1415_v24 }
 0x131   :  { %v2489_v29 = vpop.f32.mrf.mxu0 }
 0x133   :  { %v2490_v58 = vpop.f32.mrf.mxu0 }
 0x134   :  { %v2491_v7 = vadd.f32 %v2490_v58, %v2489_v29  ;;  %v1673_v29 = vsub.f32 %v3565_v46, %v4238_v19  ;;  %v1680_v58 = vsub.f32 %v3576_v39, %v4234_v14 }
 0x136   :  { %v817_v2 = vadd.f32 %v2491_v7, %v649_v50  ;;  %v1674_v33 = vand.u32 4294901760, %v1673_v29  ;;  %v1681_v51 = vand.u32 4294901760, %v1680_v58  ;;  %v1419_v7 = vld [vmem:[%s4150_s4 + $0x68] sm:$0xff]  ;;  %v1434_v50 = vld [vmem:[%s4150_s4 + $0xe0] sm:$0xff] }
 0x13a   :  { %v2524_v49 = vpop.f32.mrf.mxu1 }
 0x13c   :  { %v2525_v37 = vpop.f32.mrf.mxu1 }
 0x13d   :  { %v2526_v56 = vadd.f32 %v2525_v37, %v2524_v49  ;;  %v3608_v49 = vand.u32 4294901760, %v1419_v7  ;;  %v3613_v37 = vand.u32 4294901760, %v1434_v50 }
 0x13f   :  { %v921_v27 = vadd.f32 %v2526_v56, %v817_v2  ;;  %v1418_v2 = vld [vmem:[%s4150_s4 + $0x60] sm:$0xff]  ;;  %v3619_v56 = vsub.f32 %v1419_v7, %v3608_v49 }
 0x141   :  { %2739 = vtanh.f32 %v921_v27  ;;  %v3621_v27 = vand.u32 4294901760, %v1418_v2  ;;  %v4233_v31 = vand.u32 4294901760, %v3619_v56 }
 0x143   :  { %v3638_v63 = vsub.f32 %v1418_v2, %v3621_v27  ;;  %v3726_v2 = vsub.f32 %v1415_v24, %v3708_v12 }
 0x145   :  { %v4230_v4 = vand.u32 4294901760, %v3638_v63 }
 0x14e   :  { %v2740_v47 = vpop.eup %2739 }
 0x14f   :  { %v925_v18 = vmul.f32 1.442695, %v2740_v47  ;;  %v1433_v47 = vld [vmem:[%s4150_s4 + $0xd8] sm:$0xff] }
 0x151   :  { %2741 = vpow2.f32 %v925_v18  ;;  %v3628_v18 = vsub.f32 %v1434_v50, %v3613_v37 }
 0x15e   :  { %v2742_v23 = vpop.eup %2741 }
 0x15f   :  { %v928_v25 = vsel %vm927_vm0, %v2742_v23, 0.0 }
 0x160   :  { %929 = vadd.xlane.f32.xlu0 %v928_v25  ;;  %v1417_v25 = vld [vmem:[%s4150_s4 + $0x58] sm:$0xff] }
 0x1e9   :  { %v930_v11 = vpop.xlane.xlu0 %929 }
 0x1ea   :  { %2743 = vrcp.f32 %v930_v11 }
 0x1f7   :  { %v2744_v8 = vpop.eup %2743 }
 0x1f8   :  { %v932_v48 = vmul.f32 %v2744_v8, %v2742_v23  ;;  %v3630_v23 = vand.u32 4294901760, %v1433_v47  ;;  %v1575_v8 = vsub.f32 %v3638_v63, %v4230_v4 }
 0x1fa   :  { %v933_v53 = vadd.f32 1e-10, %v932_v48  ;;  %v3648_v45 = vsub.f32 %v1433_v47, %v3630_v23  ;;  %v1576_v62 = vand.u32 4294901760, %v1575_v8 }
 0x1fc   :  { %v937_v1 = vsel %vm927_vm0, %v933_v53, 0  ;;  %v4228_v15 = vand.u32 4294901760, %v3648_v45 }
 0x1fd   :  { %v1006_v57 = vand.u32 4294901760, %v937_v1 }
 0x1fe   :  { %v1694_v30 = vsub.f32 %v3648_v45, %v4228_v15 }
 0x1ff   :  { %v1007_v13 = vsub.f32 %v937_v1, %v1006_v57  ;;  %1093 = vmatmul.mubr.f32.vlgmr.msra.gmra.mxu1 %v1006_v57  ;;  %v1430_v1 = vld [vmem:[%s4150_s4 + $0xc0] sm:$0xff] }
 0x200   :  { %1209 = vmatpush1.msra.mxu1 %v971_v43  ;;  %1242 = vmatprep.mubr.f32.mxu1 %v2769_v40 }
 0x201   :  { %v1008_v26 = vand.u32 4294901760, %v1007_v13  ;;  %1361 = vmatprep.subr.mxu1 %v969_v35  ;;  %v3640_v35 = vand.u32 4294901760, %v1417_v25 }
 0x203   :  { %1246 = vmatmul.mubr.f32.vlgmr.msra.gmra.mxu1 %v1008_v26  ;;  %v1009_v38 = vsub.f32 %v1007_v13, %v1008_v26  ;;  %v3661_v5 = vsub.f32 %v1417_v25, %v3640_v35  ;;  %v3698_v26 = vsub.f32 %v1431_v10, %v3676_v22  ;;  %v1428_v25 = vld [vmem:[%s4150_s4 + $0xb0] sm:$0xff] }
 0x204   :  { %1363 = vmatpush1.msra.mxu1 %v971_v43  ;;  %1396 = vmatprep.mubr.f32.mxu1 %v2769_v40  ;;  %v1432_v43 = vld [vmem:[%s4150_s4 + $0xd0] sm:$0xff] }
 0x205   :  { %v1010_v52 = vand.u32 4294901760, %v1009_v38  ;;  %2562 = vmatprep.subr.mxu1 %v1667_v54  ;;  %v4227_v48 = vand.u32 4294901760, %v3661_v5  ;;  %v1414_v54 = vld [vmem:[%s4150_s4 + $0x40] sm:$0xff] }
 0x206   :  { %v3728_v47 = vand.u32 4294901760, %v1414_v54 }
 0x207   :  { %1011 = vmatmul.mubr.f32.vlgmr.msra.gmra.mxu0 %v1010_v52  ;;  %1398 = vmatmul.mubr.f32.vlgmr.msra.gmra.mxu1 %v1006_v57  ;;  %v1582_v29 = vsub.f32 %v3661_v5, %v4227_v48  ;;  %v1429_v52 = vld [vmem:[%s4150_s4 + $0xb8] sm:$0xff] }
 0x208   :  { %1134 = vmatpush1.msra.mxu0 %v3523_v59  ;;  %1167 = vmatprep.mubr.f32.mxu0 %v2769_v40  ;;  %v3650_v59 = vand.u32 4294901760, %v1432_v43  ;;  %v3740_v10 = vand.u32 4294901760, %v1429_v52  ;;  %v3748_v8 = vsub.f32 %v1414_v54, %v3728_v47 }
 0x209   :  { %1285 = vmatprep.subr.mxu0 %v1049_v0  ;;  %2563 = vmatpush3.msra.mxu1 %v1555_v44  ;;  %v1416_v0 = vld [vmem:[%s4150_s4 + $0x50] sm:$0xff]  ;;  %v1695_v44 = vand.u32 4294901760, %v1694_v30  ;;  %v1583_v7 = vand.u32 4294901760, %v1582_v29 }
 0x20a   :  { %2564 = vmatprep.subr.mxu1 %v1674_v33  ;;  %v3663_v9 = vand.u32 4294901760, %v1416_v0  ;;  %v3674_v17 = vsub.f32 %v1432_v43, %v3650_v59  ;;  %v4223_v33 = vand.u32 4294901760, %v3698_v26  ;;  %v3758_v29 = vsub.f32 %v1429_v52, %v3740_v10 }
 0x20b   :  { %1170 = vmatmul.mubr.f32.vlgmr.msra.gmra.mxu0 %v1007_v13  ;;  %2565 = vmatpush3.msra.mxu1 %v1562_v20  ;;  %v3717_v20 = vand.u32 4294901760, %v1430_v1 }
 0x20c   :  { %1289 = vmatpush1.msra.mxu0 %v1055_v3  ;;  %1322 = vmatprep.mubr.f32.mxu0 %v2769_v40  ;;  %v4231_v40 = vand.u32 4294901760, %v3628_v18  ;;  %v1568_v3 = vsub.f32 %v3619_v56, %v4233_v31  ;;  %v3687_v53 = vsub.f32 %v1416_v0, %v3663_v9  ;;  %v4225_v13 = vand.u32 4294901760, %v3674_v17 }
 0x20d   :  { %2566 = vmatprep.subr.mxu1 %v1681_v51  ;;  %2527 = vmatprep.subr.mxu0 %v3535_v16  ;;  %v1413_v51 = vld [vmem:[%s4150_s4 + $0x38] sm:$0xff]  ;;  %v1708_v0 = vsub.f32 %v3698_v26, %v4223_v33 }
 0x20e   :  { %v1687_v11 = vsub.f32 %v3628_v18, %v4231_v40  ;;  %v1569_v36 = vand.u32 4294901760, %v1568_v3  ;;  %v4224_v38 = vand.u32 4294901760, %v3687_v53  ;;  %v1701_v58 = vsub.f32 %v3674_v17, %v4225_v13 }
 0x20f   :  { %1324 = vmatmul.mubr.f32.vlgmr.msra.gmra.mxu0 %v1006_v57  ;;  %v3738_v3 = vsub.f32 %v1430_v1, %v3717_v20  ;;  %v1427_v1 = vld [vmem:[%s4150_s4 + $0xa8] sm:$0xff]  ;;  %v1709_v30 = vand.u32 4294901760, %v1708_v0 }
 0x210   :  { %2528 = vmatpush3.msra.mxu0 %v3549_v55  ;;  %v1688_v57 = vand.u32 4294901760, %v1687_v11  ;;  %2567 = vmatpush3.msra.mxu1 %v1569_v36  ;;  %v1589_v50 = vsub.f32 %v3687_v53, %v4224_v38  ;;  %v1702_v43 = vand.u32 4294901760, %v1701_v58  ;;  %v1412_v11 = vld [vmem:[%s4150_s4 + $0x30] sm:$0xff]  ;;  %v4221_v36 = vand.u32 4294901760, %v3726_v2 }
 0x211   :  { %2529 = vmatprep.subr.mxu0 %v3551_v60  ;;  %v4226_v58 = vand.u32 4294901760, %v3748_v8 }
 0x212   :  { %2530 = vmatpush3.msra.mxu0 %v3556_v42  ;;  %2568 = vmatprep.subr.mxu1 %v1688_v57  ;;  %v1590_v24 = vand.u32 4294901760, %v1589_v50  ;;  %v3750_v57 = vand.u32 4294901760, %v1413_v51  ;;  %v1596_v54 = vsub.f32 %v3726_v2, %v4221_v36  ;;  %v3770_v50 = vand.u32 4294901760, %v1412_v11 }
 0x213   :  { %2531 = vmatprep.subr.mxu0 %v3562_v28  ;;  %2569 = vmatpush3.msra.mxu1 %v1576_v62  ;;  %v4222_v62 = vand.u32 4294901760, %v3738_v3 }
 0x214   :  { %2532 = vmatpush3.msra.mxu0 %v3608_v49  ;;  %2570 = vmatprep.subr.mxu1 %v1695_v44  ;;  %v3760_v44 = vand.u32 4294901760, %v1428_v25  ;;  %v1597_v36 = vand.u32 4294901760, %v1596_v54  ;;  %v3791_v33 = vsub.f32 %v1412_v11, %v3770_v50  ;;  %v1410_v11 = vld [vmem:[%s4150_s4 + $0x20] sm:$0xff] }
 0x215   :  { %2533 = vmatprep.subr.mxu0 %v3613_v37  ;;  %2571 = vmatpush3.msra.mxu1 %v1583_v7  ;;  %v3768_v7 = vsub.f32 %v1413_v51, %v3750_v57  ;;  %v1715_v52 = vsub.f32 %v3738_v3, %v4222_v62  ;;  %v1411_v51 = vld [vmem:[%s4150_s4 + $0x28] sm:$0xff] }
 0x216   :  { %2534 = vmatpush3.msra.mxu0 %v3621_v27  ;;  %2572 = vmatprep.subr.mxu1 %v1702_v43  ;;  %v4229_v43 = vand.u32 4294901760, %v3758_v29  ;;  %v3778_v0 = vsub.f32 %v1428_v25, %v3760_v44  ;;  %4390 = vst [vmem:[#allocation7_spill] sm:$0xff] %v3791_v33  ;;  %v1426_v25 = vld [vmem:[%s4150_s4 + $0xa0] sm:$0xff]  ;;  %v4237_v15 = vand.u32 4294901760, %v3791_v33 }
 0x217   :  { %2535 = vmatprep.subr.mxu0 %v3630_v23  ;;  %2573 = vmatpush3.msra.mxu1 %v1590_v24  ;;  %4388 = vst [vmem:[#allocation23_spill] sm:$0xff] %v3768_v7  ;;  %v3780_v24 = vand.u32 4294901760, %v1427_v1  ;;  %v4232_v62 = vand.u32 4294901760, %v3768_v7  ;;  %v1716_v38 = vand.u32 4294901760, %v1715_v52 }
 0x218   :  { %2536 = vmatpush3.msra.mxu0 %v3640_v35  ;;  %2574 = vmatprep.subr.mxu1 %v1709_v30  ;;  %4389 = vst [vmem:[#allocation6_spill] sm:$0xff] %v3778_v0  ;;  %v1603_v30 = vsub.f32 %v3748_v8, %v4226_v58  ;;  %v1722_v54 = vsub.f32 %v3758_v29, %v4229_v43  ;;  %v4235_v13 = vand.u32 4294901760, %v3778_v0  ;;  %v3812_v43 = vand.u32 4294901760, %v1411_v51 }
 0x219   :  { %2537 = vmatprep.subr.mxu0 %v3650_v59  ;;  %v3802_v58 = vsub.f32 %v1427_v1, %v3780_v24  ;;  %2575 = vmatpush3.msra.mxu1 %v1597_v36  ;;  %v1610_v52 = vsub.f32 %v3768_v7, %v4232_v62  ;;  %v1425_v1 = vld [vmem:[%s4150_s4 + $0x98] sm:$0xff]  ;;  %v1617_v14 = vsub.f32 %v3791_v33, %v4237_v15 }
 0x21a   :  { %2538 = vmatpush3.msra.mxu0 %v3663_v9  ;;  %v1604_v48 = vand.u32 4294901760, %v1603_v30  ;;  %2576 = vmatprep.subr.mxu1 %v1716_v38  ;;  %v1723_v4 = vand.u32 4294901760, %v1722_v54  ;;  %v1729_v40 = vsub.f32 %v3778_v0, %v4235_v13  ;;  %v3821_v30 = vand.u32 4294901760, %v1426_v25  ;;  %v1409_v62 = vld [vmem:[%s4150_s4 + $0x18] sm:$0xff]  ;;  %v1424_v13 = vld [vmem:[%s4150_s4 + $0x90] sm:$0xff] }
 0x21b   :  { %2539 = vmatprep.subr.mxu0 %v3676_v22  ;;  %4391 = vst [vmem:[#allocation8_spill] sm:$0xff] %v3802_v58  ;;  %v4240_v36 = vand.u32 4294901760, %v3802_v58  ;;  %v1611_v31 = vand.u32 4294901760, %v1610_v52  ;;  %v3830_v38 = vsub.f32 %v1411_v51, %v3812_v43  ;;  %v3832_v54 = vand.u32 4294901760, %v1410_v11  ;;  %v1408_v51 = vld [vmem:[%s4150_s4 + $0x10] sm:$0xff] }
 0x21c   :  { %2540 = vmatpush3.msra.mxu0 %v3708_v12  ;;  %2577 = vmatpush3.msra.mxu1 %v1604_v48  ;;  %v1730_v41 = vand.u32 4294901760, %v1729_v40  ;;  %v3842_v52 = vsub.f32 %v1426_v25, %v3821_v30  ;;  %v3844_v15 = vand.u32 4294901760, %v1425_v1  ;;  %v1618_v19 = vand.u32 4294901760, %v1617_v14  ;;  %v1423_v25 = vld [vmem:[%s4150_s4 + $0x88] sm:$0xff] }
 0x21d   :  { %2541 = vmatprep.subr.mxu0 %v3717_v20  ;;  %4392 = vst [vmem:[#allocation9_spill] sm:$0xff] %v3830_v38  ;;  %2578 = vmatprep.subr.mxu1 %v1723_v4  ;;  %v1736_v48 = vsub.f32 %v3802_v58, %v4240_v36  ;;  %v4246_v4 = vand.u32 4294901760, %v3830_v38  ;;  %v3852_v40 = vsub.f32 %v1410_v11, %v3832_v54  ;;  %v3854_v32 = vand.u32 4294901760, %v1409_v62 }
 0x21e   :  { %2542 = vmatpush3.msra.mxu0 %v3728_v47  ;;  %4393 = vst [vmem:[#allocation10_spill] sm:$0xff] %v3842_v52  ;;  %2579 = vmatpush3.msra.mxu1 %v1611_v31  ;;  %v4249_v21 = vand.u32 4294901760, %v3842_v52  ;;  %v3862_v31 = vsub.f32 %v1425_v1, %v3844_v15  ;;  %v3864_v14 = vand.u32 4294901760, %v1424_v13 }
 0x21f   :  { %2543 = vmatprep.subr.mxu0 %v3740_v10  ;;  %4394 = vst [vmem:[#allocation11_spill] sm:$0xff] %v3852_v40  ;;  %4395 = vst [vmem:[#allocation12_spill] sm:$0xff] %v3854_v32  ;;  %2580 = vmatprep.subr.mxu1 %v1730_v41  ;;  %v1737_v36 = vand.u32 4294901760, %v1736_v48  ;;  %v1624_v11 = vsub.f32 %v3830_v38, %v4246_v4  ;;  %v3872_v33 = vsub.f32 %v1409_v62, %v3854_v32  ;;  %v1407_v62 = vld [vmem:[%s4150_s4 + $0x8] sm:$0xff] }
 0x220   :  { %2544 = vmatpush3.msra.mxu0 %v3750_v57  ;;  %4396 = vst [vmem:[#allocation13_spill] sm:$0xff] %v3862_v31  ;;  %4397 = vst [vmem:[#allocation14_spill] sm:$0xff] %v3864_v14  ;;  %2581 = vmatpush3.msra.mxu1 %v1618_v19  ;;  %v3874_v41 = vand.u32 4294901760, %v1408_v51  ;;  %v1743_v1 = vsub.f32 %v3842_v52, %v4249_v21  ;;  %v3882_v48 = vsub.f32 %v1424_v13, %v3864_v14  ;;  %v1422_v13 = vld [vmem:[%s4150_s4 + $0x80] sm:$0xff] }
 0x221   :  { %2545 = vmatprep.subr.mxu0 %v3760_v44  ;;  %4398 = vst [vmem:[#allocation18_spill] sm:$0xff] %v3872_v33  ;;  %2582 = vmatprep.subr.mxu1 %v1737_v36  ;;  %v3884_v4 = vand.u32 4294901760, %v1423_v25  ;;  %v1625_v58 = vand.u32 4294901760, %v1624_v11  ;;  %v4401_v36 = vand.u32 4294901760, %v3852_v40  ;;  %v4403_v0 = vand.u32 4294901760, %v3862_v31 }
 0x222   :  { %2546 = vmatpush3.msra.mxu0 %v3770_v50  ;;  %4399 = vst [vmem:[#allocation19_spill] sm:$0xff] %v3874_v41  ;;  %4400 = vst [vmem:[#allocation20_spill] sm:$0xff] %v3882_v48  ;;  %v3895_v19 = vsub.f32 %v1408_v51, %v3874_v41  ;;  %v1744_v52 = vand.u32 4294901760, %v1743_v1  ;;  %v1406_v51 = vld [vmem:[%s4150_s4] sm:$0xff]  ;;  %v3922_v7 = vand.u32 4294901760, %v1422_v13 }
 0x223   :  { %2547 = vmatprep.subr.mxu0 %v3780_v24  ;;  %v1631_v38 = vsub.f32 %v3852_v40, %v4401_v36  ;;  %v1750_v11 = vsub.f32 %v3862_v31, %v4403_v0  ;;  %v3906_v36 = vsub.f32 %v1423_v25, %v3884_v4  ;;  %2583 = vmatpush3.msra.mxu1 %v1625_v58  ;;  %v4405_v40 = vand.u32 4294901760, %v3872_v33 }
 0x224   :  { %2548 = vmatpush3.msra.mxu0 %v3812_v43  ;;  %4402 = vst [vmem:[#allocation22_spill] sm:$0xff] %v3895_v19  ;;  %v3916_v0 = vand.u32 4294901760, %v1407_v62  ;;  %2584 = vmatprep.subr.mxu1 %v1744_v52  ;;  %v4407_v25 = vand.u32 4294901760, %v3882_v48  ;;  %4408 = vst [vmem:[#allocation27_spill] sm:$0xff] %v3922_v7 }
 0x225   :  { %2549 = vmatprep.subr.mxu0 %v3821_v30  ;;  %4404 = vst [vmem:[#allocation26_spill] sm:$0xff] %v3906_v36  ;;  %v1632_v21 = vand.u32 4294901760, %v1631_v38  ;;  %v1638_v1 = vsub.f32 %v3872_v33, %v4405_v40  ;;  %v3930_v33 = vand.u32 4294901760, %v1406_v51 }
 0x226   :  { %2550 = vmatpush3.msra.mxu0 %v3832_v54  ;;  %4406 = vst [vmem:[#allocation15_spill] sm:$0xff] %v3916_v0  ;;  %v1757_v31 = vsub.f32 %v3882_v48, %v4407_v25  ;;  %v3928_v40 = vsub.f32 %v1407_v62, %v3916_v0 }
 0x227   :  { %2551 = vmatprep.subr.mxu0 %v3844_v15  ;;  %2585 = vmatpush3.msra.mxu1 %v1632_v21  ;;  %v1639_v58 = vand.u32 4294901760, %v1638_v1  ;;  %4410 = vst [vmem:[#allocation28_spill] sm:$0xff] %v3930_v33  ;;  %v3937_v21 = vsub.f32 %v1422_v13, %v3922_v7  ;;  %v3942_v25 = vsub.f32 %v1406_v51, %v3930_v33 }
 0x228   :  { %2552 = vmatpush3.msra.mxu0 %v3854_v32  ;;  %v4268_v32 = vand.u32 4294901760, %v3906_v36  ;;  %4409 = vst [vmem:[#allocation16_spill] sm:$0xff] %v3928_v40  ;;  %v1758_v52 = vand.u32 4294901760, %v1757_v31  ;;  %v4269_v62 = vand.u32 4294901760, %v3928_v40 }
 0x229   :  { %2553 = vmatprep.subr.mxu0 %v3864_v14  ;;  %v1751_v14 = vand.u32 4294901760, %v1750_v11  ;;  %4411 = vst [vmem:[#allocation24_spill] sm:$0xff] %v3937_v21  ;;  %4412 = vst [vmem:[#allocation17_spill] sm:$0xff] %v3942_v25 }
 0x22a   :  { %2554 = vmatpush3.msra.mxu0 %v3874_v41  ;;  %v4270_v41 = vand.u32 4294901760, %v3895_v19  ;;  %v1764_v11 = vsub.f32 %v3906_v36, %v4268_v32  ;;  %v1652_v13 = vsub.f32 %v3928_v40, %v4269_v62 }
 0x22b   :  { %2555 = vmatprep.subr.mxu0 %v3884_v4  ;;  %2586 = vmatprep.subr.mxu1 %v1751_v14  ;;  %v4276_v14 = vand.u32 4294901760, %v3937_v21 }
 0x22c   :  { %v1645_v38 = vsub.f32 %v3895_v19, %v4270_v41  ;;  %2556 = vmatpush3.msra.mxu0 %v3916_v0  ;;  %2587 = vmatpush3.msra.mxu1 %v1639_v58  ;;  %v1765_v31 = vand.u32 4294901760, %v1764_v11  ;;  %v4283_v58 = vand.u32 4294901760, %v3942_v25 }
 0x22d   :  { %2557 = vmatprep.subr.mxu0 %v3922_v7  ;;  %2588 = vmatprep.subr.mxu1 %v1758_v52  ;;  %v1771_v51 = vsub.f32 %v3937_v21, %v4276_v14  ;;  %v2745_v7 = vld [vmem:[%s4146_s0] sm:$0xff] }
 0x22e   :  { %v1646_v1 = vand.u32 4294901760, %v1645_v38  ;;  %2558 = vmatpush3.msra.mxu0 %v3930_v33  ;;  %v1653_v38 = vand.u32 4294901760, %v1652_v13  ;;  %v1659_v52 = vsub.f32 %v3942_v25, %v4283_v58 }
 0x22f   :  { %2597 = vmatprep.subr.mxu0 %v3547_v34  ;;  %v1772_v11 = vand.u32 4294901760, %v1771_v51 }
 0x230   :  { %2589 = vmatpush3.msra.mxu1 %v1646_v1  ;;  %v1660_v32 = vand.u32 4294901760, %v1659_v52 }
 0x231   :  { %2590 = vmatprep.subr.mxu1 %v1765_v31 }
 0x232   :  { %2591 = vmatpush3.msra.mxu1 %v1653_v38 }
 0x233   :  { %2592 = vmatprep.subr.mxu1 %v1772_v11 }
 0x234   :  { %2593 = vmatpush3.msra.mxu1 %v1660_v32 }
 0x235   :  { %2632 = vmatprep.subr.mxu1 %v3535_v16 }
 0x2bf   :  { %v1094_v1 = vpop.f32.mrf.mxu1 }
 0x2c1   :  { %v1096_v62 = vpop.f32.mrf.mxu1 }
 0x2c3   :  { %v1247_v41 = vpop.f32.mrf.mxu1 }
 0x2c5   :  { %v1249_v36 = vpop.f32.mrf.mxu1 }
 0x2c7   :  { %v1012_v31 = vpop.f32.mrf.mxu0  ;;  %v1399_v51 = vpop.f32.mrf.mxu1 }
 0x2c8   :  { %v1095_v40 = vadd.f32 %v1094_v1, %v1012_v31 }
 0x2c9   :  { %v1014_v34 = vpop.f32.mrf.mxu0  ;;  %v1401_v33 = vpop.f32.mrf.mxu1 }
 0x2ca   :  { %v1097_v13 = vadd.f32 %v1096_v62, %v1014_v34  ;;  %v2746_v34 = vld [vmem:[%s4146_s0 + $0x8] sm:$0xff]  ;;  %s2770_s0 = smov [#allocation2]  }
 0x2cb   :  { %v1171_v14 = vpop.f32.mrf.mxu0  ;;  %s2308_s25 = sshll.u32 %s2770_s0, 4  ;;  %s2309_s25 = int_to_ptr.vmem [resolvable:$true] %s2308_s25 }
 0x2cc   :  { %v1172_v21 = vadd.f32 %v1171_v14, %v1095_v40  ;;  %v4414_v14 = vld [vmem:[#allocation12_spill] sm:$0xff]  ;;  %s2747_s26 = scalar_lea.vmem %s2309_s25, 128  ;;  %p2752_p1 = scmp.lt.s32.totalorder %s2309_s25, %s2309_s25 }
 0x2cd   :  { %v1173_v19 = vpop.f32.mrf.mxu0  ;;  %p2748_p0 = scmp.ne.s32.totalorder %s2309_s25, %s2747_s26  ;;  %p2753_p2 = scmp.lt.s32.totalorder %s2747_s26, %s2747_s26 }
 0x2ce   :  { %v1174_v48 = vadd.f32 %v1173_v19, %v1097_v13  ;;  %v1248_v58 = vadd.f32 %v1247_v41, %v1172_v21  ;;  %v4416_v13 = vld [vmem:[#allocation14_spill] sm:$0xff] }
 0x2cf   :  { %v1325_v38 = vpop.f32.mrf.mxu0  ;;  %p2754_p3 = por %p2753_p2, %p2752_p1 }
 0x2d0   :  { %v1326_v52 = vadd.f32 %v1325_v38, %v1248_v58  ;;  %v1250_v11 = vadd.f32 %v1249_v36, %v1174_v48  ;;  %v4415_v58 = vld [vmem:[#allocation6_spill] sm:$0xff]  ;;  %v4418_v38 = vld [vmem:[#allocation19_spill] sm:$0xff] }
 0x2d1   :  { %v1327_v32 = vpop.f32.mrf.mxu0  ;;  %p2755_p4 = pnand %p2754_p3, %p2748_p0 }
 0x2d2   :  { %v1400_v25 = vadd.f32 %v1399_v51, %v1326_v52  ;;  %v1328_v16 = vadd.f32 %v1327_v32, %v1250_v11  ;;  %v4417_v51 = vld [vmem:[#allocation7_spill] sm:$0xff]  ;;  %v4419_v52 = vld [vmem:[#allocation8_spill] sm:$0xff]  ;;  %v4420_v11 = vld [vmem:[#allocation9_spill] sm:$0xff] }
 0x2d3   :  { %v4421_v32 = vld [vmem:[#allocation15_spill] sm:$0xff] }
 0x2d4   :  { %v1404_v1 = vmul.f32 %v2745_v7, %v1400_v25  ;;  %v1402_v31 = vadd.f32 %v1401_v33, %v1328_v16  ;;  %v4413_v25 = vld [vmem:[#allocation23_spill] sm:$0xff] }
 0x2d6   :  { %v3961_v0 = vand.u32 4294901760, %v1404_v1  ;;  %v1405_v41 = vmul.f32 %v2746_v34, %v1402_v31  ;;  %v4423_v31 = vld [vmem:[#allocation27_spill] sm:$0xff] }
 0x2d7   :  { %v4424_v34 = vld [vmem:[#allocation11_spill] sm:$0xff] }
 0x2d8   :  { %v3967_v19 = vsub.f32 %v1404_v1, %v3961_v0  ;;  %v3969_v48 = vand.u32 4294901760, %v1405_v41  ;;  %v4422_v1 = vld [vmem:[#allocation10_spill] sm:$0xff] }
 0x2da   :  { %v1535_v36 = vsub.f32 %v1405_v41, %v3969_v48  ;;  %1775 = vmatprep.mubr.f32.mxu1 %v3969_v48  ;;  %v1542_v40 = vand.u32 4294901760, %v3967_v19  ;;  %v4425_v41 = vld [vmem:[#allocation28_spill] sm:$0xff] }
 0x2db   :  { %1777 = vmatmul.mubr.f32.vlgmr.msra.gmra.mxu1 %v3961_v0 }
 0x2dc   :  { %2633 = vmatpush3.msra.mxu1 %v3549_v55  ;;  %v1536_v16 = vand.u32 4294901760, %v1535_v36  ;;  %v1543_v33 = vsub.f32 %v3967_v19, %v1542_v40 }
 0x2dd   :  { %2634 = vmatprep.subr.mxu1 %v3551_v60 }
 0x2de   :  { %2635 = vmatpush3.msra.mxu1 %v3556_v42  ;;  %2019 = vmatprep.mubr.f32.mxu1 %v1536_v16  ;;  %v1537_v7 = vsub.f32 %v1535_v36, %v1536_v16  ;;  %v1544_v62 = vand.u32 4294901760, %v1543_v33  ;;  %v4427_v16 = vld [vmem:[#allocation21_spill] sm:$0xff]  ;;  %v4428_v33 = vld [vmem:[#allocation18_spill] sm:$0xff] }
 0x2df   :  { %2636 = vmatprep.subr.mxu1 %v3562_v28 }
 0x2e0   :  { %2637 = vmatpush3.msra.mxu1 %v3608_v49  ;;  %v1538_v21 = vand.u32 4294901760, %v1537_v7  ;;  %v4429_v7 = vld [vmem:[#allocation20_spill] sm:$0xff] }
 0x2e1   :  { %2638 = vmatprep.subr.mxu1 %v3613_v37 }
 0x2e2   :  { %2639 = vmatpush3.msra.mxu1 %v3621_v27  ;;  %1539 = vmatprep.mubr.f32.mxu0 %v1538_v21  ;;  %v4430_v21 = vld [vmem:[#allocation22_spill] sm:$0xff] }
 0x2e3   :  { %2640 = vmatprep.subr.mxu1 %v3630_v23  ;;  %1545 = vmatmul.mubr.f32.vlgmr.msra.gmra.mxu0 %v1544_v62  ;;  %v4431_v62 = vld [vmem:[#allocation26_spill] sm:$0xff] }
 0x2e4   :  { %2598 = vmatpush3.msra.mxu0 %v3560_v6  ;;  %2641 = vmatpush3.msra.mxu1 %v3640_v35 }
 0x2e5   :  { %2599 = vmatprep.subr.mxu0 %v3565_v46  ;;  %1912 = vmatprep.mubr.f32.mxu0 %v1535_v36  ;;  %v4426_v36 = vld [vmem:[#allocation13_spill] sm:$0xff] }
 0x2e6   :  { %2642 = vmatprep.subr.mxu1 %v3650_v59  ;;  %2600 = vmatpush3.msra.mxu0 %v3568_v61 }
 0x2e7   :  { %2643 = vmatpush3.msra.mxu1 %v3663_v9  ;;  %2601 = vmatprep.subr.mxu0 %v3576_v39 }
 0x2e8   :  { %2644 = vmatprep.subr.mxu1 %v3676_v22  ;;  %2602 = vmatpush3.msra.mxu0 %v3619_v56 }
 0x2e9   :  { %2645 = vmatpush3.msra.mxu1 %v3708_v12  ;;  %2603 = vmatprep.subr.mxu0 %v3628_v18 }
 0x2ea   :  { %2646 = vmatprep.subr.mxu1 %v3717_v20  ;;  %2604 = vmatpush3.msra.mxu0 %v3638_v63 }
 0x2eb   :  { %2647 = vmatpush3.msra.mxu1 %v3728_v47  ;;  %2605 = vmatprep.subr.mxu0 %v3648_v45 }
 0x2ec   :  { %2648 = vmatprep.subr.mxu1 %v3740_v10  ;;  %2606 = vmatpush3.msra.mxu0 %v3661_v5 }
 0x2ed   :  { %2649 = vmatpush3.msra.mxu1 %v3750_v57  ;;  %2607 = vmatprep.subr.mxu0 %v3674_v17 }
 0x2ee   :  { %2650 = vmatprep.subr.mxu1 %v3760_v44  ;;  %2608 = vmatpush3.msra.mxu0 %v3687_v53 }
 0x2ef   :  { %2651 = vmatpush3.msra.mxu1 %v3770_v50  ;;  %2609 = vmatprep.subr.mxu0 %v3698_v26 }
 0x2f0   :  { %2652 = vmatprep.subr.mxu1 %v3780_v24  ;;  %2610 = vmatpush3.msra.mxu0 %v3726_v2 }
 0x2f1   :  { %2653 = vmatpush3.msra.mxu1 %v3812_v43  ;;  %2611 = vmatprep.subr.mxu0 %v3738_v3 }
 0x2f2   :  { %2654 = vmatprep.subr.mxu1 %v3821_v30  ;;  %2612 = vmatpush3.msra.mxu0 %v3748_v8 }
 0x2f3   :  { %2655 = vmatpush3.msra.mxu1 %v3832_v54  ;;  %2613 = vmatprep.subr.mxu0 %v3758_v29 }
 0x2f4   :  { %2656 = vmatprep.subr.mxu1 %v3844_v15  ;;  %2614 = vmatpush3.msra.mxu0 %v4413_v25 }
 0x2f5   :  { %2657 = vmatpush3.msra.mxu1 %v4414_v14  ;;  %2615 = vmatprep.subr.mxu0 %v4415_v58 }
 0x2f6   :  { %2658 = vmatprep.subr.mxu1 %v4416_v13  ;;  %2616 = vmatpush3.msra.mxu0 %v4417_v51 }
 0x2f7   :  { %2659 = vmatpush3.msra.mxu1 %v4418_v38  ;;  %2617 = vmatprep.subr.mxu0 %v4419_v52 }
 0x2f8   :  { %2660 = vmatprep.subr.mxu1 %v3884_v4  ;;  %2618 = vmatpush3.msra.mxu0 %v4420_v11 }
 0x2f9   :  { %2661 = vmatpush3.msra.mxu1 %v4421_v32  ;;  %2619 = vmatprep.subr.mxu0 %v4422_v1 }
 0x2fa   :  { %2662 = vmatprep.subr.mxu1 %v4423_v31  ;;  %2620 = vmatpush3.msra.mxu0 %v4424_v34 }
 0x2fb   :  { %2663 = vmatpush3.msra.mxu1 %v4425_v41  ;;  %2621 = vmatprep.subr.mxu0 %v4426_v36 }
 0x2fc   :  { %2023 = vmatmul.mubr.f32.vlgmr.msra.gmra.mxu1 %v1542_v40  ;;  %2702 = vmatprep.subr.mxu1 %v4427_v16  ;;  %v4432_v40 = vld [vmem:[#allocation16_spill] sm:$0xff] }
 0x2fd   :  { %2622 = vmatpush3.msra.mxu0 %v4428_v33  ;;  %2703 = vmatpush3.msra.mxu1 %v3549_v55  ;;  %v4433_v16 = vld [vmem:[#allocation24_spill] sm:$0xff]  ;;  %v4434_v55 = vld [vmem:[#allocation17_spill] sm:$0xff] }
 0x2fe   :  { %2293 = vmatprep.mubr.f32.mxu1 %v3969_v48  ;;  %2623 = vmatprep.subr.mxu0 %v4429_v7 }
 0x2ff   :  { %2704 = vmatprep.subr.mxu1 %v3551_v60  ;;  %2624 = vmatpush3.msra.mxu0 %v4430_v21  ;;  %v4435_v60 = vld [vmem:[#allocation5_spill] sm:$0xff] }
 0x300   :  { %2705 = vmatpush3.msra.mxu1 %v3556_v42  ;;  %2625 = vmatprep.subr.mxu0 %v4431_v62  ;;  %v4436_v42 = vand.u32 4294901760, %v4435_v60 }
 0x301   :  { %2706 = vmatprep.subr.mxu1 %v3562_v28  ;;  %2626 = vmatpush3.msra.mxu0 %v4432_v40  ;;  %v4437_v28 = vand.u32 4294901760, %v3560_v6  ;;  %v4441_v6 = vand.u32 4294901760, %v3619_v56  ;;  %v4445_v56 = vand.u32 4294901760, %v3661_v5  ;;  %v4452_v5 = vand.u32 4294901760, %v3758_v29 }
 0x302   :  { %2707 = vmatpush3.msra.mxu1 %v3608_v49  ;;  %2627 = vmatprep.subr.mxu0 %v4433_v16  ;;  %v4438_v49 = vand.u32 4294901760, %v3565_v46  ;;  %v4442_v46 = vand.u32 4294901760, %v3628_v18  ;;  %v4446_v18 = vand.u32 4294901760, %v3674_v17  ;;  %v4454_v17 = vand.u32 4294901760, %v4415_v58 }
 0x303   :  { %2708 = vmatprep.subr.mxu1 %v3613_v37  ;;  %2628 = vmatpush3.msra.mxu0 %v4434_v55  ;;  %v4439_v37 = vand.u32 4294901760, %v3568_v61  ;;  %v4443_v61 = vand.u32 4294901760, %v3638_v63  ;;  %v4448_v63 = vand.u32 4294901760, %v3698_v26  ;;  %v4458_v26 = vand.u32 4294901760, %v4422_v1 }
 0x304   :  { %2709 = vmatpush3.msra.mxu1 %v3621_v27  ;;  %1915 = vmatmul.mubr.f32.vlgmr.msra.gmra.mxu0 %v3967_v19  ;;  %v4440_v27 = vand.u32 4294901760, %v3576_v39  ;;  %v4444_v39 = vand.u32 4294901760, %v3648_v45  ;;  %v4450_v45 = vand.u32 4294901760, %v3738_v3  ;;  %v4463_v3 = vand.u32 4294901760, %v4430_v21 }
 0x305   :  { %2667 = vmatprep.subr.mxu0 %v4436_v42  ;;  %2710 = vmatprep.subr.mxu1 %v3630_v23  ;;  %v4447_v23 = vand.u32 4294901760, %v3687_v53  ;;  %v4456_v53 = vand.u32 4294901760, %v4419_v52  ;;  %v4467_v29 = vand.u32 4294901760, %v4434_v55 }
 0x306   :  { %2668 = vmatpush3.msra.mxu0 %v4437_v28  ;;  %2189 = vmatprep.mubr.f32.mxu0 %v3969_v48 }
 0x307   :  { %2711 = vmatpush3.msra.mxu1 %v3640_v35  ;;  %2669 = vmatprep.subr.mxu0 %v4438_v49  ;;  %v4449_v35 = vand.u32 4294901760, %v3726_v2  ;;  %v4461_v2 = vand.u32 4294901760, %v4428_v33 }
 0x308   :  { %2712 = vmatprep.subr.mxu1 %v3650_v59  ;;  %2670 = vmatpush3.msra.mxu0 %v4439_v37  ;;  %v4451_v59 = vand.u32 4294901760, %v3748_v8  ;;  %v4465_v8 = vand.u32 4294901760, %v4432_v40 }
 0x309   :  { %2713 = vmatpush3.msra.mxu1 %v3663_v9  ;;  %2671 = vmatprep.subr.mxu0 %v4440_v27  ;;  %v4453_v9 = vand.u32 4294901760, %v4413_v25 }
 0x30a   :  { %2714 = vmatprep.subr.mxu1 %v3676_v22  ;;  %2672 = vmatpush3.msra.mxu0 %v4441_v6  ;;  %v4455_v22 = vand.u32 4294901760, %v4417_v51 }
 0x30b   :  { %2715 = vmatpush3.msra.mxu1 %v3708_v12  ;;  %2673 = vmatprep.subr.mxu0 %v4442_v46  ;;  %v4459_v12 = vand.u32 4294901760, %v4424_v34 }
 0x30c   :  { %2716 = vmatprep.subr.mxu1 %v3717_v20  ;;  %2674 = vmatpush3.msra.mxu0 %v4443_v61  ;;  %v4460_v20 = vand.u32 4294901760, %v4426_v36 }
 0x30d   :  { %2717 = vmatpush3.msra.mxu1 %v3728_v47  ;;  %2675 = vmatprep.subr.mxu0 %v4444_v39  ;;  %v4462_v47 = vand.u32 4294901760, %v4429_v7 }
 0x30e   :  { %2718 = vmatprep.subr.mxu1 %v3740_v10  ;;  %2676 = vmatpush3.msra.mxu0 %v4445_v56  ;;  %v4464_v10 = vand.u32 4294901760, %v4431_v62 }
 0x30f   :  { %2719 = vmatpush3.msra.mxu1 %v3750_v57  ;;  %2677 = vmatprep.subr.mxu0 %v4446_v18  ;;  %v4466_v57 = vand.u32 4294901760, %v4433_v16 }
 0x310   :  { %2720 = vmatprep.subr.mxu1 %v3760_v44  ;;  %2678 = vmatpush3.msra.mxu0 %v4447_v23 }
 0x311   :  { %2721 = vmatpush3.msra.mxu1 %v3770_v50  ;;  %2679 = vmatprep.subr.mxu0 %v4448_v63 }
 0x312   :  { %2722 = vmatprep.subr.mxu1 %v3780_v24  ;;  %2680 = vmatpush3.msra.mxu0 %v4449_v35 }
 0x313   :  { %2723 = vmatpush3.msra.mxu1 %v3812_v43  ;;  %2681 = vmatprep.subr.mxu0 %v4450_v45 }
 0x314   :  { %2724 = vmatprep.subr.mxu1 %v3821_v30  ;;  %2682 = vmatpush3.msra.mxu0 %v4451_v59 }
 0x315   :  { %2725 = vmatpush3.msra.mxu1 %v3832_v54  ;;  %2683 = vmatprep.subr.mxu0 %v4452_v5 }
 0x316   :  { %2726 = vmatprep.subr.mxu1 %v3844_v15  ;;  %2684 = vmatpush3.msra.mxu0 %v4453_v9  ;;  %v4457_v15 = vand.u32 4294901760, %v4420_v11 }
 0x317   :  { %2727 = vmatpush3.msra.mxu1 %v4414_v14  ;;  %2685 = vmatprep.subr.mxu0 %v4454_v17 }
 0x318   :  { %2728 = vmatprep.subr.mxu1 %v4416_v13  ;;  %2686 = vmatpush3.msra.mxu0 %v4455_v22 }
 0x319   :  { %2729 = vmatpush3.msra.mxu1 %v4418_v38  ;;  %2687 = vmatprep.subr.mxu0 %v4456_v53 }
 0x31a   :  { %2730 = vmatprep.subr.mxu1 %v3884_v4  ;;  %2688 = vmatpush3.msra.mxu0 %v4457_v15 }
 0x31b   :  { %2731 = vmatpush3.msra.mxu1 %v4421_v32  ;;  %2689 = vmatprep.subr.mxu0 %v4458_v26 }
 0x31c   :  { %2732 = vmatprep.subr.mxu1 %v4423_v31  ;;  %2690 = vmatpush3.msra.mxu0 %v4459_v12 }
 0x31d   :  { %2733 = vmatpush3.msra.mxu1 %v4425_v41  ;;  %2691 = vmatprep.subr.mxu0 %v4460_v20 }
 0x31e   :  { %2295 = vmatmul.mubr.f32.vlgmr.msra.gmra.mxu1 %v3961_v0  ;;  %2692 = vmatpush3.msra.mxu0 %v4461_v2 }
 0x31f   :  { %2693 = vmatprep.subr.mxu0 %v4462_v47 }
 0x320   :  { %2694 = vmatpush3.msra.mxu0 %v4463_v3 }
 0x321   :  { %2695 = vmatprep.subr.mxu0 %v4464_v10 }
 0x322   :  { %2696 = vmatpush3.msra.mxu0 %v4465_v8 }
 0x323   :  { %2697 = vmatprep.subr.mxu0 %v4466_v57 }
 0x324   :  { %2698 = vmatpush3.msra.mxu0 %v4467_v29 }
 0x325   :  { %2191 = vmatmul.mubr.f32.vlgmr.msra.gmra.mxu0 %v3961_v0 }
 0x39b   :  { %v2594_v50 = vpop.f32.mrf.mxu1 }
 0x39d   :  { %v2595_v30 = vpop.f32.mrf.mxu1 }
 0x39e   :  { %v2596_v48 = vadd.f32 %v2595_v30, %v2594_v50 }
 0x3a3   :  { %v2559_v44 = vpop.f32.mrf.mxu0 }
 0x3a5   :  { %v2560_v43 = vpop.f32.mrf.mxu0 }
 0x3a6   :  { %v2561_v19 = vadd.f32 %v2560_v43, %v2559_v44 }
 0x3a8   :  { %v1779_v58 = vadd.f32 %v2596_v48, %v2561_v19 }
 0x3bc   :  { %v2664_v54 = vpop.f32.mrf.mxu1 }
 0x3be   :  { %v2665_v14 = vpop.f32.mrf.mxu1 }
 0x3bf   :  { %v2666_v52 = vadd.f32 %v2665_v14, %v2664_v54 }
 0x3c4   :  { %v2629_v24 = vpop.f32.mrf.mxu0 }
 0x3c6   :  { %v2630_v4 = vpop.f32.mrf.mxu0 }
 0x3c7   :  { %v2631_v25 = vadd.f32 %v2630_v4, %v2629_v24 }
 0x3c9   :  { %v1917_v51 = vadd.f32 %v2631_v25, %v1779_v58 }
 0x3cb   :  { %v2025_v1 = vadd.f32 %v2666_v52, %v1917_v51 }
 0x3de   :  { %v2734_v13 = vpop.f32.mrf.mxu1 }
 0x3e0   :  { %v2735_v11 = vpop.f32.mrf.mxu1 }
 0x3e1   :  { %v2736_v31 = vadd.f32 %v2735_v11, %v2734_v13 }
 0x3e5   :  { %v2699_v38 = vpop.f32.mrf.mxu0 }
 0x3e7   :  { %v2700_v32 = vpop.f32.mrf.mxu0 }
 0x3e8   :  { %v2701_v0 = vadd.f32 %v2700_v32, %v2699_v38 }
 0x3ea   :  { %v2193_v34 = vadd.f32 %v2701_v0, %v2025_v1 }
 0x3ec   :  { %v2297_v41 = vadd.f32 %v2736_v31, %v2193_v34 }
 0x3ee   :  { %2301 = vst.msk [vmem:[#allocation2] sm:$0xff] %vm2300_vm1, %v2297_v41 }
 0x3ef   :  { %2758 = shalt.err (!%p2755_p4)
}
 0x3f0   :  { %2311 = dma.vmem_to_hbm [thread:$0]  %s2309_s25, 128, %s4151_s5, [#allocation3]  }
 0x3f1   :  { %2767 = dma.done.wait [#allocation3], 128  }
 0x3f2   :  { %2768 = vsyncadd [#allocation3], 4294967168 }
 0x3f3   :  { %2315 = vsyncpa [#allocation3], 1 }

</bundles_post_ra>
